<compile_context>
chip_gen: v7x
topology: tpu7x:2x2x1
jax: 0.10.0
libtpu: 0.0.40
codegen_flags: <defaults>
</compile_context>

<pallas_src>
import functools

import jax
import jax.numpy as jnp
from jax.experimental import pallas as pl
from jax.experimental.pallas import tpu as pltpu


# --------------------------------------------------------------------------- kernel
def _contextnet_kernel(feat_ref, w_cls_ref, b_cls_ref, w_enc_ref, b_enc_ref,
                       out_ref, proj_ref, *, hw_true):
    """Fused global-average-pool + classifier/encoder Linear heads.

    feat_ref  : [TB, HW, C]     trunk feature-map tile (f32 or bf16)
    w_cls_ref : [C, num_class]  b_cls_ref : [1, num_class]
    w_enc_ref : [C, emb_size]   b_enc_ref : [1, emb_size]
    out_ref   : [TB, num_class] proj_ref  : [TB, emb_size]

    NOTE: rows of a partial final batch tile contain garbage; they flow through the
    pool/matmul row-wise (no cross-row coupling) and Pallas masks their stores.
    """
    tb, _, c = feat_ref.shape

    # AdaptiveAvgPool2d((1,1)) + view(B, -1)  ==  mean over the spatial axis.
    # Chunked (8-sublane) reduction: never materializes a full f32 copy of the tile
    # (at real shapes that copy is ~10 MB and spills); accumulate in f32.
    CHUNK = 8
    acc = jnp.zeros((tb, c), jnp.float32)
    start = 0
    while start < hw_true:            # static trace-time loop (HW is small for a trunk output)
        size = min(CHUNK, hw_true - start)
        acc = acc + jnp.sum(
            feat_ref[:, pl.ds(start, size), :].astype(jnp.float32), axis=1)
        start += size
    # Divide by the TRUE H*W (static), never the (possibly padded) block extent.
    pooled = acc * (1.0 / hw_true)

    # Two small head matmuls against VMEM-resident weights; MXU cost is negligible
    # next to the feature-map HBM stream.
    out_ref[...] = (
        jnp.dot(pooled.astype(w_cls_ref.dtype), w_cls_ref[...],
                preferred_element_type=jnp.float32) + b_cls_ref[...]
    ).astype(out_ref.dtype)
    proj_ref[...] = (
        jnp.dot(pooled.astype(w_enc_ref.dtype), w_enc_ref[...],
                preferred_element_type=jnp.float32) + b_enc_ref[...]
    ).astype(proj_ref.dtype)


# ----------------------------------------------------------------- VMEM accounting
def _round_up(x, m):
    return ((x + m - 1) // m) * m


def _vmem_capacity_bytes():
    try:
        return int(pltpu.get_tpu_info().vmem_capacity_bytes)
    except Exception:
        return 64 * 1024 * 1024  # conservative (v7x per-TensorCore physical VMEM)


def _pick_batch_tile(batch, hw, c, feat_itemsize, ncls, nemb, w_itemsize,
                     weight_bufs, vmem_budget_bytes):
    """Largest batch tile whose full VMEM working set fits the budget.

    Accounts for: 2x (double-buffered) feature tile with sublane padding of HW,
    2x both output tiles, the weight slab x its buffer count, biases, and the f32
    pooling accumulator / chunk temporary.
    """
    c_pad = _round_up(c, 128)
    ncls_pad = _round_up(ncls, 128)
    nemb_pad = _round_up(nemb, 128)
    # Sublane padding of the spatial axis: 8 rows for f32, 16 for bf16, 32 for int8.
    hw_pad = _round_up(hw, 32 // feat_itemsize)

    # Fixed residents (independent of the batch tile).
    fixed = weight_bufs * c_pad * (ncls_pad + nemb_pad) * w_itemsize   # weight slabs
    fixed += 2 * 8 * (ncls_pad + nemb_pad) * w_itemsize                # biases (padded)
    fixed += 2 * 1024 * 1024                                           # Mosaic scratch headroom

    # Per-sample VMEM (scales with the batch tile).
    per_sample = 2 * hw_pad * c_pad * feat_itemsize        # double-buffered feature stream
    per_sample += 2 * (ncls_pad + nemb_pad) * 4            # double-buffered outputs (f32)
    per_sample += c_pad * 4                                 # f32 pooling accumulator
    per_sample += 8 * c_pad * 4                             # f32 upcast chunk temporary

    avail = max(0, vmem_budget_bytes - fixed)
    tb = max(1, avail // per_sample)

    if batch <= 8:
        # Can't split further while keeping 8-row output alignment.
        return batch
    # Keep >= 2 grid steps so the feature DMA overlaps compute and (on v7x) both
    # TensorCores get work via the "parallel" batch axis.
    tb = min(tb, batch // 2)
    # NOTE: the max(8, ...) clamp could in principle exceed a very small budget;
    # the generation-aware vmem_limit below keeps this safe at real shapes.
    tb = max(8, (tb // 8) * 8)
    return min(tb, batch)


# ----------------------------------------------------------------------- wrapper
def contextnet_single_task_forward(feat_nhwc, w_cls, b_cls, w_enc, b_enc, *,
                                   batch_tile=None, vmem_limit_bytes=None):
    """Forward of ContextNetSingleTask downstream of the ResNet50 conv trunk.

    feat_nhwc : [B, H, W, C] trunk feature map (NHWC; f32 or bf16 — bf16 recommended,
                it halves the dominant HBM read)
    w_cls     : [C, num_class]  (transposed vs. torch Linear)   b_cls: [num_class]
    w_enc     : [C, emb_size]                                    b_enc: [emb_size]
    returns (out [B, num_class], graph_proj [B, emb_size])
    """
    B, H, W, C = feat_nhwc.shape
    num_class = w_cls.shape[1]
    emb_size = w_enc.shape[1]
    HW = H * W

    # Free reshape (no transpose, no extra HBM pass): channels stay on the lane axis.
    feat = feat_nhwc.reshape(B, HW, C)
    b_cls2 = b_cls.reshape(1, num_class)
    b_enc2 = b_enc.reshape(1, emb_size)

    if vmem_limit_bytes is None:
        cap = _vmem_capacity_bytes()
        # ~96 MiB on v5e/v6e (128 MiB physical), ~48 MiB on v7x (64 MiB physical).
        vmem_limit_bytes = (cap * 3) // 4
    vmem_limit_bytes = int(vmem_limit_bytes)

    have_buffered = hasattr(pl, "Buffered")

    def build(weight_bufs):
        if batch_tile is not None:
            tb = int(batch_tile)
        else:
            tb = _pick_batch_tile(B, HW, C, feat.dtype.itemsize, num_class,
                                  emb_size, w_cls.dtype.itemsize, weight_bufs,
                                  vmem_limit_bytes)
        grid = (pl.cdiv(B, tb),)
        kernel = functools.partial(_contextnet_kernel, hw_true=HW)

        def resident_spec(shape):
            # Constant block index -> fetched once, VMEM-resident. Single-buffered
            # when supported (the second buffer buys nothing for a constant block).
            if weight_bufs == 1 and have_buffered:
                return pl.BlockSpec(shape, lambda i: (0, 0),
                                    pipeline_mode=pl.Buffered(1))
            return pl.BlockSpec(shape, lambda i: (0, 0))

        cost = pl.CostEstimate(
            flops=2 * B * C * (num_class + emb_size) + B * HW * C,
            transcendentals=0,
            bytes_accessed=int(
                feat.size * feat.dtype.itemsize
                + w_cls.size * w_cls.dtype.itemsize
                + w_enc.size * w_enc.dtype.itemsize
                + (num_class + emb_size) * 4
                + B * (num_class + emb_size) * 4
            ),
        )

        return pl.pallas_call(
            kernel,
            out_shape=(jax.ShapeDtypeStruct((B, num_class), jnp.float32),
                       jax.ShapeDtypeStruct((B, emb_size), jnp.float32)),
            grid=grid,
            in_specs=[
                # Batch-tiled feature stream (double-buffered by the Pallas pipeline).
                pl.BlockSpec((tb, HW, C), lambda i: (i, 0, 0)),
                resident_spec((C, num_class)),
                resident_spec((1, num_class)),
                resident_spec((C, emb_size)),
                resident_spec((1, emb_size)),
            ],
            out_specs=(pl.BlockSpec((tb, num_class), lambda i: (i, 0)),
                       pl.BlockSpec((tb, emb_size), lambda i: (i, 0))),
            compiler_params=pltpu.CompilerParams(
                # Batch steps are independent -> shard across v7x's 2 TensorCores.
                dimension_semantics=("parallel",),
                vmem_limit_bytes=vmem_limit_bytes,
            ),
            cost_estimate=cost,
        )

    try:
        out, graph_proj = build(1)(feat, w_cls, b_cls2, w_enc, b_enc2)
    except Exception:
        # pipeline_mode=pl.Buffered(1) unsupported on this jax build -> fall back to
        # default double-buffered constant-index weight specs (previously verified).
        out, graph_proj = build(2)(feat, w_cls, b_cls2, w_enc, b_enc2)
    return out, graph_proj


# ------------------------------------------------------------------------- demo
if __name__ == "__main__":
    # Small, lane-aligned stand-in shapes:
    #   len_last (ResNet50 fc.in_features = 2048 in the real model) -> 256
    #   num_class -> 16, emb_size -> 32
    #   trunk output feature map (NHWC): [B=16, Hf=4, Wf=4, C=256]
    B, Hf, Wf, C = 16, 4, 4, 256
    num_class, emb_size = 16, 32

    key = jax.random.PRNGKey(0)
    k_feat, k_wc, k_bc, k_we, k_be = jax.random.split(key, 5)

    feat_nhwc = jax.random.normal(k_feat, (B, Hf, Wf, C), dtype=jnp.float32)
    # Deterministic parameter init (torch Linear stores [out, in]; we keep [in, out]).
    w_cls = jax.random.normal(k_wc, (C, num_class), dtype=jnp.float32) * (1.0 / C ** 0.5)
    b_cls = jax.random.normal(k_bc, (num_class,), dtype=jnp.float32) * 0.01
    w_enc = jax.random.normal(k_we, (C, emb_size), dtype=jnp.float32) * (1.0 / C ** 0.5)
    b_enc = jax.random.normal(k_be, (emb_size,), dtype=jnp.float32) * 0.01

    # f32 feature stream, auto-picked batch tile (B=16 -> tb=8 -> 2 pipelined steps).
    out, graph_proj = jax.block_until_ready(
        contextnet_single_task_forward(feat_nhwc, w_cls, b_cls, w_enc, b_enc)
    )

    # Plain-JAX reference (pool + two heads).
    pooled_ref = jnp.mean(feat_nhwc, axis=(1, 2))                 # [B, C]
    out_ref = pooled_ref @ w_cls + b_cls
    proj_ref = pooled_ref @ w_enc + b_enc

    assert out.shape == (B, num_class) and graph_proj.shape == (B, emb_size)
    assert jnp.allclose(out, out_ref, rtol=1e-4, atol=1e-4)
    assert jnp.allclose(graph_proj, proj_ref, rtol=1e-4, atol=1e-4)

    # bf16 feature stream (recommended deployment path: halves the dominant HBM read;
    # the kernel still accumulates the pool and matmul in f32).
    feat_bf16 = feat_nhwc.astype(jnp.bfloat16)
    out_b, proj_b = jax.block_until_ready(
        contextnet_single_task_forward(feat_bf16, w_cls, b_cls, w_enc, b_enc,
                                       batch_tile=8)
    )
    pooled_b = jnp.mean(feat_bf16.astype(jnp.float32), axis=(1, 2))
    out_b_ref = pooled_b @ w_cls + b_cls
    proj_b_ref = pooled_b @ w_enc + b_enc
    assert jnp.allclose(out_b, out_b_ref, rtol=1e-3, atol=1e-3)
    assert jnp.allclose(proj_b, proj_b_ref, rtol=1e-3, atol=1e-3)

    print("KERNEL_OK")
</pallas_src>

<mosaic_0001>
module attributes {stable_mosaic.version = 11 : i64} {
  func.func @_contextnet_kernel(%arg0: i32, %arg1: memref<8x16x256xf32, #tpu.memory_space<vmem>>, %arg2: memref<256x16xf32, #tpu.memory_space<vmem>>, %arg3: memref<1x16xf32, #tpu.memory_space<vmem>>, %arg4: memref<256x32xf32, #tpu.memory_space<vmem>>, %arg5: memref<1x32xf32, #tpu.memory_space<vmem>>, %arg6: memref<8x16xf32, #tpu.memory_space<vmem>>, %arg7: memref<8x32xf32, #tpu.memory_space<vmem>>) attributes {dimension_semantics = [#tpu.dimension_semantics<parallel>], iteration_bounds = array<i64: 2>, scalar_prefetch = 0 : i64, scratch_operands = 0 : i64, tpu.core_type = #tpu.core_type<tc>, window_params = [{transform_indices = @transform_0, window_bounds = array<i64: 8, 16, 256>}, {pipeline_mode = #tpu.pipeline_mode<synchronous>, transform_indices = @transform_1, window_bounds = array<i64: 256, 16>}, {pipeline_mode = #tpu.pipeline_mode<synchronous>, transform_indices = @transform_2, window_bounds = array<i64: 1, 16>}, {pipeline_mode = #tpu.pipeline_mode<synchronous>, transform_indices = @transform_3, window_bounds = array<i64: 256, 32>}, {pipeline_mode = #tpu.pipeline_mode<synchronous>, transform_indices = @transform_4, window_bounds = array<i64: 1, 32>}, {transform_indices = @transform_5, window_bounds = array<i64: 8, 16>}, {transform_indices = @transform_6, window_bounds = array<i64: 8, 32>}]} {
    %cst = arith.constant 0.000000e+00 : f32
    %0 = vector.broadcast %cst : f32 to vector<8x256xf32>
    %c0 = arith.constant 0 : index
    %c0_0 = arith.constant 0 : index
    %c0_1 = arith.constant 0 : index
    %1 = vector.load %arg1[%c0, %c0_0, %c0_1] : memref<8x16x256xf32, #tpu.memory_space<vmem>>, vector<8x8x256xf32>
    %cst_2 = arith.constant dense<0.000000e+00> : vector<8x256xf32>
    %2 = vector.multi_reduction <add>, %1, %cst_2 [1] : vector<8x8x256xf32> to vector<8x256xf32>
    %3 = arith.addf %0, %2 : vector<8x256xf32>
    %c0_3 = arith.constant 0 : index
    %c8 = arith.constant 8 : index
    %c0_4 = arith.constant 0 : index
    %4 = vector.load %arg1[%c0_3, %c8, %c0_4] : memref<8x16x256xf32, #tpu.memory_space<vmem>>, vector<8x8x256xf32>
    %cst_5 = arith.constant dense<0.000000e+00> : vector<8x256xf32>
    %5 = vector.multi_reduction <add>, %4, %cst_5 [1] : vector<8x8x256xf32> to vector<8x256xf32>
    %6 = arith.addf %3, %5 : vector<8x256xf32>
    %cst_6 = arith.constant 6.250000e-02 : f32
    %7 = vector.broadcast %cst_6 : f32 to vector<8x256xf32>
    %8 = arith.mulf %6, %7 : vector<8x256xf32>
    %c0_7 = arith.constant 0 : index
    %c0_8 = arith.constant 0 : index
    %9 = vector.load %arg2[%c0_7, %c0_8] : memref<256x16xf32, #tpu.memory_space<vmem>>, vector<256x16xf32>
    %cst_9 = arith.constant dense<0.000000e+00> : vector<8x16xf32>
    %10 = tpu.matmul %8, %9, %cst_9 {dimension_numbers = #tpu.dot_dimension_numbers<[1], [0], [0], [1], [0, 0, 1, 1], [], []>} : vector<8x256xf32>, vector<256x16xf32>, vector<8x16xf32> -> vector<8x16xf32>
    %c0_10 = arith.constant 0 : index
    %c0_11 = arith.constant 0 : index
    %11 = vector.load %arg3[%c0_10, %c0_11] : memref<1x16xf32, #tpu.memory_space<vmem>>, vector<1x16xf32>
    %12 = vector.broadcast %11 : vector<1x16xf32> to vector<8x16xf32>
    %13 = arith.addf %10, %12 : vector<8x16xf32>
    %c0_12 = arith.constant 0 : index
    %c0_13 = arith.constant 0 : index
    %14 = vector.load %arg6[%c0_12, %c0_13] : memref<8x16xf32, #tpu.memory_space<vmem>>, vector<8x16xf32>
    tpu.vector_store %arg6[%c0_12, %c0_13], %13 {strides = array<i32>} : memref<8x16xf32, #tpu.memory_space<vmem>>, vector<8x16xf32>,
    %c0_14 = arith.constant 0 : index
    %c0_15 = arith.constant 0 : index
    %15 = vector.load %arg4[%c0_14, %c0_15] : memref<256x32xf32, #tpu.memory_space<vmem>>, vector<256x32xf32>
    %cst_16 = arith.constant dense<0.000000e+00> : vector<8x32xf32>
    %16 = tpu.matmul %8, %15, %cst_16 {dimension_numbers = #tpu.dot_dimension_numbers<[1], [0], [0], [1], [0, 0, 1, 1], [], []>} : vector<8x256xf32>, vector<256x32xf32>, vector<8x32xf32> -> vector<8x32xf32>
    %c0_17 = arith.constant 0 : index
    %c0_18 = arith.constant 0 : index
    %17 = vector.load %arg5[%c0_17, %c0_18] : memref<1x32xf32, #tpu.memory_space<vmem>>, vector<1x32xf32>
    %18 = vector.broadcast %17 : vector<1x32xf32> to vector<8x32xf32>
    %19 = arith.addf %16, %18 : vector<8x32xf32>
    %c0_19 = arith.constant 0 : index
    %c0_20 = arith.constant 0 : index
    %20 = vector.load %arg7[%c0_19, %c0_20] : memref<8x32xf32, #tpu.memory_space<vmem>>, vector<8x32xf32>
    tpu.vector_store %arg7[%c0_19, %c0_20], %19 {strides = array<i32>} : memref<8x32xf32, #tpu.memory_space<vmem>>, vector<8x32xf32>,
    return
  }
  func.func @transform_0(%arg0: i32) -> (i32, i32, i32) {
    %c0_i32 = arith.constant 0 : i32
    %c0_i32_0 = arith.constant 0 : i32
    %c0_i32_1 = arith.constant 0 : i32
    return %arg0, %c0_i32, %c0_i32_0 : i32, i32, i32
  }
  func.func @transform_1(%arg0: i32) -> (i32, i32) {
    %c0_i32 = arith.constant 0 : i32
    %c0_i32_0 = arith.constant 0 : i32
    %c0_i32_1 = arith.constant 0 : i32
    return %c0_i32, %c0_i32_0 : i32, i32
  }
  func.func @transform_2(%arg0: i32) -> (i32, i32) {
    %c0_i32 = arith.constant 0 : i32
    %c0_i32_0 = arith.constant 0 : i32
    %c0_i32_1 = arith.constant 0 : i32
    return %c0_i32, %c0_i32_0 : i32, i32
  }
  func.func @transform_3(%arg0: i32) -> (i32, i32) {
    %c0_i32 = arith.constant 0 : i32
    %c0_i32_0 = arith.constant 0 : i32
    %c0_i32_1 = arith.constant 0 : i32
    return %c0_i32, %c0_i32_0 : i32, i32
  }
  func.func @transform_4(%arg0: i32) -> (i32, i32) {
    %c0_i32 = arith.constant 0 : i32
    %c0_i32_0 = arith.constant 0 : i32
    %c0_i32_1 = arith.constant 0 : i32
    return %c0_i32, %c0_i32_0 : i32, i32
  }
  func.func @transform_5(%arg0: i32) -> (i32, i32) {
    %c0_i32 = arith.constant 0 : i32
    %c0_i32_0 = arith.constant 0 : i32
    return %arg0, %c0_i32 : i32, i32
  }
  func.func @transform_6(%arg0: i32) -> (i32, i32) {
    %c0_i32 = arith.constant 0 : i32
    %c0_i32_0 = arith.constant 0 : i32
    return %arg0, %c0_i32 : i32, i32
  }
}

module attributes {stable_mosaic.version = 11 : i64} {
  func.func @_contextnet_kernel(%arg0: i32, %arg1: memref<8x16x256xf32, #tpu.memory_space<vmem>>, %arg2: memref<256x16xf32, #tpu.memory_space<vmem>>, %arg3: memref<1x16xf32, #tpu.memory_space<vmem>>, %arg4: memref<256x32xf32, #tpu.memory_space<vmem>>, %arg5: memref<1x32xf32, #tpu.memory_space<vmem>>, %arg6: memref<8x16xf32, #tpu.memory_space<vmem>>, %arg7: memref<8x32xf32, #tpu.memory_space<vmem>>) attributes {dimension_semantics = [#tpu.dimension_semantics<parallel>], iteration_bounds = array<i64: 2>, scalar_prefetch = 0 : i64, scratch_operands = 0 : i64, tpu.core_type = #tpu.core_type<tc>, window_params = [{transform_indices = @transform_0, window_bounds = array<i64: 8, 16, 256>}, {pipeline_mode = #tpu.pipeline_mode<synchronous>, transform_indices = @transform_1, window_bounds = array<i64: 256, 16>}, {pipeline_mode = #tpu.pipeline_mode<synchronous>, transform_indices = @transform_2, window_bounds = array<i64: 1, 16>}, {pipeline_mode = #tpu.pipeline_mode<synchronous>, transform_indices = @transform_3, window_bounds = array<i64: 256, 32>}, {pipeline_mode = #tpu.pipeline_mode<synchronous>, transform_indices = @transform_4, window_bounds = array<i64: 1, 32>}, {transform_indices = @transform_5, window_bounds = array<i64: 8, 16>}, {transform_indices = @transform_6, window_bounds = array<i64: 8, 32>}]} {
    %cst = arith.constant 0.000000e+00 : f32
    %0 = vector.broadcast %cst : f32 to vector<8x256xf32>
    %c0 = arith.constant 0 : index
    %c0_0 = arith.constant 0 : index
    %c0_1 = arith.constant 0 : index
    %1 = vector.load %arg1[%c0, %c0_0, %c0_1] : memref<8x16x256xf32, #tpu.memory_space<vmem>>, vector<8x8x256xf32>
    %cst_2 = arith.constant dense<0.000000e+00> : vector<8x256xf32>
    %2 = vector.multi_reduction <add>, %1, %cst_2 [1] : vector<8x8x256xf32> to vector<8x256xf32>
    %3 = arith.addf %0, %2 : vector<8x256xf32>
    %c0_3 = arith.constant 0 : index
    %c8 = arith.constant 8 : index
    %c0_4 = arith.constant 0 : index
    %4 = vector.load %arg1[%c0_3, %c8, %c0_4] : memref<8x16x256xf32, #tpu.memory_space<vmem>>, vector<8x8x256xf32>
    %cst_5 = arith.constant dense<0.000000e+00> : vector<8x256xf32>
    %5 = vector.multi_reduction <add>, %4, %cst_5 [1] : vector<8x8x256xf32> to vector<8x256xf32>
    %6 = arith.addf %3, %5 : vector<8x256xf32>
    %cst_6 = arith.constant 6.250000e-02 : f32
    %7 = vector.broadcast %cst_6 : f32 to vector<8x256xf32>
    %8 = arith.mulf %6, %7 : vector<8x256xf32>
    %c0_7 = arith.constant 0 : index
    %c0_8 = arith.constant 0 : index
    %9 = vector.load %arg2[%c0_7, %c0_8] : memref<256x16xf32, #tpu.memory_space<vmem>>, vector<256x16xf32>
    %cst_9 = arith.constant dense<0.000000e+00> : vector<8x16xf32>
    %10 = tpu.matmul %8, %9, %cst_9 {dimension_numbers = #tpu.dot_dimension_numbers<[1], [0], [0], [1], [0, 0, 1, 1], [], []>} : vector<8x256xf32>, vector<256x16xf32>, vector<8x16xf32> -> vector<8x16xf32>
    %c0_10 = arith.constant 0 : index
    %c0_11 = arith.constant 0 : index
    %11 = vector.load %arg3[%c0_10, %c0_11] : memref<1x16xf32, #tpu.memory_space<vmem>>, vector<1x16xf32>
    %12 = vector.broadcast %11 : vector<1x16xf32> to vector<8x16xf32>
    %13 = arith.addf %10, %12 : vector<8x16xf32>
    %c0_12 = arith.constant 0 : index
    %c0_13 = arith.constant 0 : index
    %14 = vector.load %arg6[%c0_12, %c0_13] : memref<8x16xf32, #tpu.memory_space<vmem>>, vector<8x16xf32>
    tpu.vector_store %arg6[%c0_12, %c0_13], %13 {strides = array<i32>} : memref<8x16xf32, #tpu.memory_space<vmem>>, vector<8x16xf32>,
    %c0_14 = arith.constant 0 : index
    %c0_15 = arith.constant 0 : index
    %15 = vector.load %arg4[%c0_14, %c0_15] : memref<256x32xf32, #tpu.memory_space<vmem>>, vector<256x32xf32>
    %cst_16 = arith.constant dense<0.000000e+00> : vector<8x32xf32>
    %16 = tpu.matmul %8, %15, %cst_16 {dimension_numbers = #tpu.dot_dimension_numbers<[1], [0], [0], [1], [0, 0, 1, 1], [], []>} : vector<8x256xf32>, vector<256x32xf32>, vector<8x32xf32> -> vector<8x32xf32>
    %c0_17 = arith.constant 0 : index
    %c0_18 = arith.constant 0 : index
    %17 = vector.load %arg5[%c0_17, %c0_18] : memref<1x32xf32, #tpu.memory_space<vmem>>, vector<1x32xf32>
    %18 = vector.broadcast %17 : vector<1x32xf32> to vector<8x32xf32>
    %19 = arith.addf %16, %18 : vector<8x32xf32>
    %c0_19 = arith.constant 0 : index
    %c0_20 = arith.constant 0 : index
    %20 = vector.load %arg7[%c0_19, %c0_20] : memref<8x32xf32, #tpu.memory_space<vmem>>, vector<8x32xf32>
    tpu.vector_store %arg7[%c0_19, %c0_20], %19 {strides = array<i32>} : memref<8x32xf32, #tpu.memory_space<vmem>>, vector<8x32xf32>,
    return
  }
  func.func @transform_0(%arg0: i32) -> (i32, i32, i32) {
    %c0_i32 = arith.constant 0 : i32
    %c0_i32_0 = arith.constant 0 : i32
    %c0_i32_1 = arith.constant 0 : i32
    return %arg0, %c0_i32, %c0_i32_0 : i32, i32, i32
  }
  func.func @transform_1(%arg0: i32) -> (i32, i32) {
    %c0_i32 = arith.constant 0 : i32
    %c0_i32_0 = arith.constant 0 : i32
    %c0_i32_1 = arith.constant 0 : i32
    return %c0_i32, %c0_i32_0 : i32, i32
  }
  func.func @transform_2(%arg0: i32) -> (i32, i32) {
    %c0_i32 = arith.constant 0 : i32
    %c0_i32_0 = arith.constant 0 : i32
    %c0_i32_1 = arith.constant 0 : i32
    return %c0_i32, %c0_i32_0 : i32, i32
  }
  func.func @transform_3(%arg0: i32) -> (i32, i32) {
    %c0_i32 = arith.constant 0 : i32
    %c0_i32_0 = arith.constant 0 : i32
    %c0_i32_1 = arith.constant 0 : i32
    return %c0_i32, %c0_i32_0 : i32, i32
  }
  func.func @transform_4(%arg0: i32) -> (i32, i32) {
    %c0_i32 = arith.constant 0 : i32
    %c0_i32_0 = arith.constant 0 : i32
    %c0_i32_1 = arith.constant 0 : i32
    return %c0_i32, %c0_i32_0 : i32, i32
  }
  func.func @transform_5(%arg0: i32) -> (i32, i32) {
    %c0_i32 = arith.constant 0 : i32
    %c0_i32_0 = arith.constant 0 : i32
    return %arg0, %c0_i32 : i32, i32
  }
  func.func @transform_6(%arg0: i32) -> (i32, i32) {
    %c0_i32 = arith.constant 0 : i32
    %c0_i32_0 = arith.constant 0 : i32
    return %arg0, %c0_i32 : i32, i32
  }
}

</mosaic_0001>

<bundles_post_ra>
// kernel: tpu_custom_call.1
= control target key start
LH: loop header
LB: loop body
LE: loop exit
PB: predicated region body
PF: predicated region fallthrough
CT: control target
= control target key end

     0   :  { %12 = vsyncpa [#allocation3], 0  ;;  %s1687_s0 = inlined_call_operand.vmem [shape: f32[16,16,256], index: 0, kind: input, shape index: {}]   ;;  %s1688_s1 = inlined_call_operand.vmem [shape: f32[256,16], index: 1, kind: input, shape index: {}]   ;;  %s1689_s2 = inlined_call_operand.vmem [shape: f32[1,16], index: 2, kind: input, shape index: {}]   ;;  %s1690_s3 = inlined_call_operand.vmem [shape: f32[256,32], index: 3, kind: input, shape index: {}]   ;;  %s1691_s4 = inlined_call_operand.vmem [shape: f32[1,32], index: 4, kind: input, shape index: {}]   ;;  %s1692_s5 = inlined_call_operand.hbm [shape: f32[16,16], index: 5, kind: output, shape index: {0}]   ;;  %s1693_s6 = inlined_call_operand.hbm [shape: f32[16,32], index: 6, kind: output, shape index: {1}]  }
   0x1   :  { %14 = vsyncpa [#allocation3 + $0x1], 0 }
   0x2   :  { %15 = vsyncpa [#allocation5], 0 }
   0x3   :  { %17 = vsyncpa [#allocation5 + $0x1], 0  ;;  %s1251_s21 = smov 0   ;;  %s1253_s22 = smov 0  }
   0x4   :  { %s1255_s23 = smov 0   ;;  %s1257_s24 = smov 0  }
   0x5 LB: > { %s1272_s25 = sadd.s32 4294967295, %s1212_s24   ;;  %s922_s26 = sadd.s32 4294967294, %s1212_s24   ;;  %s1212_s24 = sphi %s1257_s24, %s1700_s24   ;;  %s1208_s23 = sphi %s1255_s23, %s1699_s23   ;;  %s1204_s22 = sphi %s1253_s22, %s1698_s22   ;;  %s1200_s21 = sphi %s1251_s21, %s1697_s21  }
   0x6   : > { %s1276_s27 = sadd.s32 1, %s1212_s24   ;;  %s140_s28 = sadd.s32 1, %s1208_s23 }
   0x7   : > { %s137_s29 = ssub.s32 %s1212_s24, %s1276_s27  ;;  %p150_p0 = scmp.ne.s32.totalorder %s1208_s23, %s1204_s22 }
   0x8   : > { %p138_p1 = scmp.eq.s32.totalorder %s137_s29, 0  ;;  %p151_p2 = scmp.eq.s32.totalorder %s1272_s25, 1 }
   0x9   : > { %p156_p3 = scmp.ne.s32.totalorder %s1204_s22, %s1200_s21  ;;  %p157_p4 = scmp.eq.s32.totalorder %s922_s26, 1 }
   0xa   : > { %s1287_s30 = scalar_select %p138_p1, %s1208_s23, %s140_s28  }
   0xb   : > { %p1289_p5 = por %p151_p2, %p150_p0  ;;  %p1293_p6 = por %p157_p4, %p156_p3 }
   0xc   : > { %p925_p7 = scmp.ge.s32.totalorder %s1212_s24, 1  ;;  %p223_p8 = scmp.lt.s32.totalorder %s1212_s24, 3 }
   0xe   : > { %p224_p9 = pnand %p925_p7, %p223_p8 }
   0xf   : > { %v554_v0 = vld [vmem:[%s1688_s1 + $0x80] sm:$0xff] (!%p224_p9)  ;;  %v555_v1 = vld [vmem:[%s1688_s1 + $0x88] sm:$0xff] (!%p224_p9)  ;;  %v556_v11 = vld [vmem:[%s1688_s1 + $0x90] sm:$0xff] (!%p224_p9)  ;;  %s928_s9 = sshll.u32 (!%p224_p9), %s1272_s25, 3  ;;  %vm593_vm0 = vcmask (!%p224_p9), 1041409   ;;  %vm595_vm1 = vcmask (!%p224_p9), 1042434  }
  0x10   : > { %227 = sbr.rel (%p224_p9) target bundleno = 358 (0x166), region = 40  ;;  %v704_v2 = vld [vmem:[%s1690_s3 + $0x80] sm:$0xff] (!%p224_p9)  ;;  %v1010_v3 = vpack.c.bf16 (!%p224_p9), %v555_v1, %v554_v0  ;;  %v705_v4 = vld [vmem:[%s1690_s3 + $0x88] sm:$0xff] (!%p224_p9)  ;;  %v557_v13 = vld [vmem:[%s1688_s1 + $0x98] sm:$0xff] (!%p224_p9)  ;;  %p1374_p10 = scmp.lt.s32.totalorder (!%p224_p9), %s928_s9, 15  ;;  %vm597_vm2 = vcmask (!%p224_p9), 1043459  }
  0x11   : > { %v538_v5 = vld [vmem:[%s1688_s1] sm:$0xff] (!%p224_p9)  ;;  %v539_v6 = vld [vmem:[%s1688_s1 + $0x8] sm:$0xff] (!%p224_p9)  ;;  %v1042_v7 = vpack.c.bf16 (!%p224_p9), %v705_v4, %v704_v2  ;;  %v706_v14 = vld [vmem:[%s1690_s3 + $0x90] sm:$0xff] (!%p224_p9)  ;;  %v1014_v16 = vpack.c.bf16 (!%p224_p9), %v557_v13, %v556_v11  ;;  %vm599_vm3 = vcmask (!%p224_p9), 1044484   ;;  %vm601_vm4 = vcmask (!%p224_p9), 1045509   ;;  %s935_s14 = sshll.u32 (!%p224_p9), %s1272_s25, 7 }
  0x12   : > { %v1012_v8 = vpack.c.bf16 (!%p224_p9), %v539_v6, %v538_v5  ;;  %v688_v9 = vld [vmem:[%s1690_s3] sm:$0xff] (!%p224_p9)  ;;  %v689_v10 = vld [vmem:[%s1690_s3 + $0x8] sm:$0xff] (!%p224_p9)  ;;  %1011 = vmatprep.subr.bf16.mxu0 (!%p224_p9), %v1010_v3  ;;  %v707_v15 = vld [vmem:[%s1690_s3 + $0x98] sm:$0xff] (!%p224_p9)  ;;  %vm603_vm5 = vcmask (!%p224_p9), 1046534   ;;  %vm605_vm6 = vcmask (!%p224_p9), 1047559   ;;  %vm686_vm7 = vcmask (!%p224_p9), 130048   ;;  %s1615_s13 = scalar_lea.hbm (!%p224_p9), %s1692_s5, %s935_s14  ;;  %s1622_s17 = scalar_lea.hbm (!%p224_p9), %s1693_s6, %s935_s14 }
  0x13   : > { %v1044_v12 = vpack.c.bf16 (!%p224_p9), %v689_v10, %v688_v9  ;;  %1043 = vmatprep.subr.bf16.mxu1 (!%p224_p9), %v1042_v7  ;;  %v1046_v17 = vpack.c.bf16 (!%p224_p9), %v707_v15, %v706_v14  ;;  %v540_v18 = vld [vmem:[%s1688_s1 + $0x10] sm:$0xff] (!%p224_p9)  ;;  %v541_v19 = vld [vmem:[%s1688_s1 + $0x18] sm:$0xff] (!%p224_p9)  ;;  %v558_v23 = vld [vmem:[%s1688_s1 + $0xa0] sm:$0xff] (!%p224_p9)  ;;  %vm797_vm8 = vcmask (!%p224_p9), 261120   ;;  %s1214_s19 = smov (!%p224_p9), [#allocation2]  }
  0x14   : > { %1013 = vmatpush3.bf16.msra.mxu0 (!%p224_p9), %v1012_v8  ;;  %v690_v20 = vld [vmem:[%s1690_s3 + $0x10] sm:$0xff] (!%p224_p9)  ;;  %v1016_v21 = vpack.c.bf16 (!%p224_p9), %v541_v19, %v540_v18  ;;  %v691_v22 = vld [vmem:[%s1690_s3 + $0x18] sm:$0xff] (!%p224_p9)  ;;  %v559_v24 = vld [vmem:[%s1688_s1 + $0xa8] sm:$0xff] (!%p224_p9)  ;;  %s1122_s20 = sshll.u32 (!%p224_p9), %s1214_s19, 4  ;;  %s1123_s20 = int_to_ptr.vmem [resolvable:$false] %s1122_s20 }
  0x15   : > { %1045 = vmatpush3.bf16.msra.mxu1 (!%p224_p9), %v1044_v12  ;;  %1015 = vmatprep.subr.bf16.mxu0 (!%p224_p9), %v1014_v16  ;;  %v1048_v25 = vpack.c.bf16 (!%p224_p9), %v691_v22, %v690_v20  ;;  %v1018_v26 = vpack.c.bf16 (!%p224_p9), %v559_v24, %v558_v23  ;;  %v708_v27 = vld [vmem:[%s1690_s3 + $0xa0] sm:$0xff] (!%p224_p9)  ;;  %v709_v28 = vld [vmem:[%s1690_s3 + $0xa8] sm:$0xff] (!%p224_p9)  ;;  %v560_v35 = vld [vmem:[%s1688_s1 + $0xb0] sm:$0xff] (!%p224_p9)  ;;  %s1124_s11 = scalar_lea.vmem (!%p224_p9), %s1123_s20, 256 }
  0x16   : > { %1047 = vmatprep.subr.bf16.mxu1 (!%p224_p9), %v1046_v17  ;;  %v542_v29 = vld [vmem:[%s1688_s1 + $0x20] sm:$0xff] (!%p224_p9)  ;;  %v1050_v30 = vpack.c.bf16 (!%p224_p9), %v709_v28, %v708_v27  ;;  %v543_v31 = vld [vmem:[%s1688_s1 + $0x28] sm:$0xff] (!%p224_p9)  ;;  %v561_v36 = vld [vmem:[%s1688_s1 + $0xb8] sm:$0xff] (!%p224_p9) }
  0x17   : > { %v692_v32 = vld [vmem:[%s1690_s3 + $0x20] sm:$0xff]  ;;  %v693_v33 = vld [vmem:[%s1690_s3 + $0x28] sm:$0xff]  ;;  %v1020_v34 = vpack.c.bf16 %v543_v31, %v542_v29  ;;  %v710_v37 = vld [vmem:[%s1690_s3 + $0xb0] sm:$0xff]  ;;  %v1022_v39 = vpack.c.bf16 %v561_v36, %v560_v35  ;;  %s1702_s9 = smov (!%p1374_p10, %s928_s9), 15 }
  0x18   : > { %1017 = vmatpush3.bf16.msra.mxu0 %v1016_v21  ;;  %v1052_v38 = vpack.c.bf16 %v693_v33, %v692_v32  ;;  %v711_v40 = vld [vmem:[%s1690_s3 + $0xb8] sm:$0xff]  ;;  %v544_v41 = vld [vmem:[%s1688_s1 + $0x30] sm:$0xff]  ;;  %v562_v46 = vld [vmem:[%s1688_s1 + $0xc0] sm:$0xff]  ;;  %s939_s28 = sshll.u32 %s1702_s9, 5 }
  0x19   : > { %1049 = vmatpush3.bf16.msra.mxu1 %v1048_v25  ;;  %1019 = vmatprep.subr.bf16.mxu0 %v1018_v26  ;;  %v545_v42 = vld [vmem:[%s1688_s1 + $0x38] sm:$0xff]  ;;  %v1054_v43 = vpack.c.bf16 %v711_v40, %v710_v37  ;;  %v694_v44 = vld [vmem:[%s1690_s3 + $0x30] sm:$0xff]  ;;  %v563_v47 = vld [vmem:[%s1688_s1 + $0xc8] sm:$0xff]  ;;  %s1489_s16 = scalar_lea.vmem %s1687_s0, %s939_s28 }
  0x1a   : > { %1051 = vmatprep.subr.bf16.mxu1 %v1050_v30  ;;  %v695_v45 = vld [vmem:[%s1690_s3 + $0x38] sm:$0xff]  ;;  %v712_v48 = vld [vmem:[%s1690_s3 + $0xc0] sm:$0xff]  ;;  %v713_v49 = vld [vmem:[%s1690_s3 + $0xc8] sm:$0xff]  ;;  %v1024_v50 = vpack.c.bf16 %v545_v42, %v544_v41  ;;  %v1026_v54 = vpack.c.bf16 %v563_v47, %v562_v46 }
  0x1b   : > { %v546_v51 = vld [vmem:[%s1688_s1 + $0x40] sm:$0xff]  ;;  %v547_v52 = vld [vmem:[%s1688_s1 + $0x48] sm:$0xff]  ;;  %v1056_v53 = vpack.c.bf16 %v695_v45, %v694_v44  ;;  %v564_v57 = vld [vmem:[%s1688_s1 + $0xd0] sm:$0xff]  ;;  %v1058_v58 = vpack.c.bf16 %v713_v49, %v712_v48 }
  0x1c   : > { %1021 = vmatpush3.bf16.msra.mxu0 %v1020_v34  ;;  %v696_v55 = vld [vmem:[%s1690_s3 + $0x40] sm:$0xff]  ;;  %v697_v56 = vld [vmem:[%s1690_s3 + $0x48] sm:$0xff]  ;;  %v565_v59 = vld [vmem:[%s1688_s1 + $0xd8] sm:$0xff]  ;;  %v1028_v2 = vpack.c.bf16 %v547_v52, %v546_v51 }
  0x1d   : > { %1053 = vmatpush3.bf16.msra.mxu1 %v1052_v38  ;;  %1023 = vmatprep.subr.bf16.mxu0 %v1022_v39  ;;  %v714_v60 = vld [vmem:[%s1690_s3 + $0xd0] sm:$0xff]  ;;  %v715_v61 = vld [vmem:[%s1690_s3 + $0xd8] sm:$0xff]  ;;  %v566_v3 = vld [vmem:[%s1688_s1 + $0xe0] sm:$0xff]  ;;  %v1060_v6 = vpack.c.bf16 %v697_v56, %v696_v55  ;;  %v1030_v7 = vpack.c.bf16 %v565_v59, %v564_v57 }
  0x1e   : > { %1055 = vmatprep.subr.bf16.mxu1 %v1054_v43  ;;  %v548_v62 = vld [vmem:[%s1688_s1 + $0x50] sm:$0xff]  ;;  %v549_v63 = vld [vmem:[%s1688_s1 + $0x58] sm:$0xff]  ;;  %v567_v4 = vld [vmem:[%s1688_s1 + $0xe8] sm:$0xff]  ;;  %v1062_v11 = vpack.c.bf16 %v715_v61, %v714_v60 }
  0x1f   : > { %v698_v0 = vld [vmem:[%s1690_s3 + $0x50] sm:$0xff]  ;;  %v699_v1 = vld [vmem:[%s1690_s3 + $0x58] sm:$0xff]  ;;  %v716_v5 = vld [vmem:[%s1690_s3 + $0xe0] sm:$0xff]  ;;  %v1032_v18 = vpack.c.bf16 %v549_v63, %v548_v62  ;;  %v1034_v20 = vpack.c.bf16 %v567_v4, %v566_v3 }
  0x20   : > { %1025 = vmatpush3.bf16.msra.mxu0 %v1024_v50  ;;  %v717_v8 = vld [vmem:[%s1690_s3 + $0xe8] sm:$0xff]  ;;  %v550_v9 = vld [vmem:[%s1688_s1 + $0x60] sm:$0xff]  ;;  %v568_v14 = vld [vmem:[%s1688_s1 + $0xf0] sm:$0xff]  ;;  %v1064_v19 = vpack.c.bf16 %v699_v1, %v698_v0 }
  0x21   : > { %1057 = vmatpush3.bf16.msra.mxu1 %v1056_v53  ;;  %1027 = vmatprep.subr.bf16.mxu0 %v1026_v54  ;;  %v551_v10 = vld [vmem:[%s1688_s1 + $0x68] sm:$0xff]  ;;  %v1478_v12 = vld [vmem:[%s1690_s3 + $0x60] sm:$0xff]  ;;  %v569_v15 = vld [vmem:[%s1688_s1 + $0xf8] sm:$0xff]  ;;  %v1066_v21 = vpack.c.bf16 %v717_v8, %v716_v5 }
  0x22   : > { %1059 = vmatprep.subr.bf16.mxu1 %v1058_v58  ;;  %v701_v13 = vld [vmem:[%s1690_s3 + $0x68] sm:$0xff]  ;;  %v1497_v16 = vld [vmem:[%s1690_s3 + $0xf0] sm:$0xff]  ;;  %v1502_v17 = vld [vmem:[%s1690_s3 + $0xf8] sm:$0xff]  ;;  %v1036_v25 = vpack.c.bf16 %v551_v10, %v550_v9  ;;  %v1038_v27 = vpack.c.bf16 %v569_v15, %v568_v14 }
  0x23   : > { %v1507_v22 = vld [vmem:[%s1688_s1 + $0x70] sm:$0xff]  ;;  %v1512_v23 = vld [vmem:[%s1688_s1 + $0x78] sm:$0xff]  ;;  %v1068_v26 = vpack.c.bf16 %v701_v13, %v1478_v12  ;;  %v267_v29 = vld [vmem:[%s1489_s16 + $0x8] sm:$0xff]  ;;  %v1070_v31 = vpack.c.bf16 %v1502_v17, %v1497_v16 }
  0x24   : > { %1029 = vmatpush3.bf16.msra.mxu0 %v1028_v2  ;;  %v1517_v24 = vld [vmem:[%s1690_s3 + $0x70] sm:$0xff]  ;;  %v1523_v28 = vld [vmem:[%s1690_s3 + $0x78] sm:$0xff]  ;;  %v269_v30 = vld [vmem:[%s1489_s16 + $0x28] sm:$0xff]  ;;  %v1040_v32 = vpack.c.bf16 %v1512_v23, %v1507_v22  ;;  %v288_v36 = vrot.slane %v267_v29, 4 }
  0x25   : > { %1061 = vmatpush3.bf16.msra.mxu1 %v1060_v6  ;;  %1031 = vmatprep.subr.bf16.mxu0 %v1030_v7  ;;  %v271_v33 = vld [vmem:[%s1489_s16 + $0x48] sm:$0xff]  ;;  %v300_v37 = vrot.slane %v269_v30, 4  ;;  %v1072_v38 = vpack.c.bf16 %v1523_v28, %v1517_v24  ;;  %v395_v13 = vld [vmem:[%s1489_s16 + $0x18] sm:$0xff] }
  0x26   : > { %1063 = vmatprep.subr.bf16.mxu1 %v1062_v11  ;;  %v273_v34 = vld [vmem:[%s1489_s16 + $0x68] sm:$0xff]  ;;  %v312_v42 = vrot.slane %v271_v33, 4  ;;  %v289_v45 = vadd.f32 %v288_v36, %v267_v29  ;;  %v397_v14 = vld [vmem:[%s1489_s16 + $0x38] sm:$0xff] }
  0x27   : > { %v275_v35 = vld [vmem:[%s1489_s16 + $0x88] sm:$0xff]  ;;  %v324_v43 = vrot.slane %v273_v34, 4  ;;  %v301_v46 = vadd.f32 %v300_v37, %v269_v30  ;;  %v409_v30 = vld [vmem:[%s1489_s16 + $0xf8] sm:$0xff] }
  0x28   : > { %v277_v39 = vld [vmem:[%s1489_s16 + $0xa8] sm:$0xff]  ;;  %v336_v44 = vrot.slane %v275_v35, 4  ;;  %1033 = vmatpush3.bf16.msra.mxu0 %v1032_v18  ;;  %v313_v49 = vadd.f32 %v312_v42, %v271_v33  ;;  %v290_v53 = vrot.slane %v289_v45, 2 }
  0x29   : > { %v279_v40 = vld [vmem:[%s1489_s16 + $0xc8] sm:$0xff]  ;;  %v348_v47 = vrot.slane %v277_v39, 4  ;;  %1065 = vmatpush3.bf16.msra.mxu1 %v1064_v19  ;;  %1035 = vmatprep.subr.bf16.mxu0 %v1034_v20  ;;  %v325_v50 = vadd.f32 %v324_v43, %v273_v34  ;;  %v302_v54 = vrot.slane %v301_v46, 2  ;;  %v399_v19 = vld [vmem:[%s1489_s16 + $0x58] sm:$0xff] }
  0x2a   : > { %v281_v41 = vld [vmem:[%s1489_s16 + $0xe8] sm:$0xff]  ;;  %v360_v48 = vrot.slane %v279_v40, 4  ;;  %v337_v51 = vadd.f32 %v336_v44, %v275_v35  ;;  %1067 = vmatprep.subr.bf16.mxu1 %v1066_v21  ;;  %v314_v57 = vrot.slane %v313_v49, 2  ;;  %v291_v61 = vadd.f32 %v290_v53, %v289_v45  ;;  %v401_v20 = vld [vmem:[%s1489_s16 + $0x78] sm:$0xff] }
  0x2b   : > { %v372_v52 = vrot.slane %v281_v41, 4  ;;  %v349_v55 = vadd.f32 %v348_v47, %v277_v39  ;;  %v326_v58 = vrot.slane %v325_v50, 2  ;;  %v303_v62 = vadd.f32 %v302_v54, %v301_v46  ;;  %v403_v21 = vld [vmem:[%s1489_s16 + $0x98] sm:$0xff] }
  0x2c   : > { %v361_v56 = vadd.f32 %v360_v48, %v279_v40  ;;  %v338_v59 = vrot.slane %v337_v51, 2  ;;  %1037 = vmatpush3.bf16.msra.mxu0 %v1036_v25  ;;  %v315_v1 = vadd.f32 %v314_v57, %v313_v49  ;;  %v292_v5 = vrot.slane %v291_v61, 1 }
  0x2d   : > { %v373_v60 = vadd.f32 %v372_v52, %v281_v41  ;;  %v350_v63 = vrot.slane %v349_v55, 2  ;;  %1069 = vmatpush3.bf16.msra.mxu1 %v1068_v26  ;;  %1039 = vmatprep.subr.bf16.mxu0 %v1038_v27  ;;  %v327_v2 = vadd.f32 %v326_v58, %v325_v50  ;;  %v304_v6 = vrot.slane %v303_v62, 1  ;;  %v405_v26 = vld [vmem:[%s1489_s16 + $0xb8] sm:$0xff] }
  0x2e   : > { %v362_v0 = vrot.slane %v361_v56, 2  ;;  %v339_v3 = vadd.f32 %v338_v59, %v337_v51  ;;  %1071 = vmatprep.subr.bf16.mxu1 %v1070_v31  ;;  %v316_v9 = vrot.slane %v315_v1, 1  ;;  %v1541_v15 = vadd.f32 %v292_v5, %v291_v61  ;;  %v407_v27 = vld [vmem:[%s1489_s16 + $0xd8] sm:$0xff] }
  0x2f   : > { %v374_v4 = vrot.slane %v373_v60, 2  ;;  %v351_v7 = vadd.f32 %v350_v63, %v349_v55  ;;  %v328_v10 = vrot.slane %v327_v2, 1  ;;  %v1543_v16 = vadd.f32 %v304_v6, %v303_v62 }
  0x30   : > { %v363_v8 = vadd.f32 %v362_v0, %v361_v56  ;;  %v340_v11 = vrot.slane %v339_v3, 1  ;;  %1041 = vmatpush3.bf16.msra.mxu0 %v1040_v32  ;;  %v1548_v22 = vadd.f32 %v316_v9, %v315_v1  ;;  %v416_v31 = vrot.slane %v395_v13, 4 }
  0x31   : > { %v375_v12 = vadd.f32 %v374_v4, %v373_v60  ;;  %v352_v17 = vrot.slane %v351_v7, 1  ;;  %1073 = vmatpush3.bf16.msra.mxu1 %v1072_v38  ;;  %v1550_v23 = vadd.f32 %v328_v10, %v327_v2  ;;  %v428_v32 = vrot.slane %v397_v14, 4 }
  0x32   : > { %v364_v18 = vrot.slane %v363_v8, 1  ;;  %v1552_v24 = vadd.f32 %v340_v11, %v339_v3  ;;  %v440_v34 = vrot.slane %v399_v19, 4  ;;  %v452_v35 = vrot.slane %v401_v20, 4 }
  0x33   : > { %v376_v25 = vrot.slane %v375_v12, 1  ;;  %v1556_v28 = vadd.f32 %v352_v17, %v351_v7  ;;  %v464_v36 = vrot.slane %v403_v21, 4  ;;  %v417_v37 = vadd.f32 %v416_v31, %v395_v13 }
  0x34   : > { %v1558_v29 = vadd.f32 %v364_v18, %v363_v8  ;;  %v429_v38 = vadd.f32 %v428_v32, %v397_v14  ;;  %v476_v39 = vrot.slane %v405_v26, 4  ;;  %v488_v40 = vrot.slane %v407_v27, 4 }
  0x35   : > { %v1561_v33 = vadd.f32 %v376_v25, %v375_v12  ;;  %v441_v41 = vadd.f32 %v440_v34, %v399_v19  ;;  %v453_v42 = vadd.f32 %v452_v35, %v401_v20  ;;  %v465_v43 = vadd.f32 %v464_v36, %v403_v21  ;;  %v270_v34 = vld [vmem:[%s1489_s16 + $0x40] sm:$0xff] }
  0x36   : > { %v500_v44 = vrot.slane %v409_v30, 4  ;;  %v418_v45 = vrot.slane %v417_v37, 2  ;;  %v430_v46 = vrot.slane %v429_v38, 2  ;;  %v477_v47 = vadd.f32 %v476_v39, %v405_v26  ;;  %v266_v26 = vld [vmem:[%s1489_s16] sm:$0xff] }
  0x37   : > { %v489_v48 = vadd.f32 %v488_v40, %v407_v27  ;;  %v442_v49 = vrot.slane %v441_v41, 2  ;;  %v454_v50 = vrot.slane %v453_v42, 2  ;;  %v466_v51 = vrot.slane %v465_v43, 2  ;;  %v276_v40 = vld [vmem:[%s1489_s16 + $0xa0] sm:$0xff] }
  0x38   : > { %v501_v52 = vadd.f32 %v500_v44, %v409_v30  ;;  %v419_v53 = vadd.f32 %v418_v45, %v417_v37  ;;  %v431_v54 = vadd.f32 %v430_v46, %v429_v38  ;;  %v478_v55 = vrot.slane %v477_v47, 2  ;;  %v274_v38 = vld [vmem:[%s1489_s16 + $0x80] sm:$0xff] }
  0x39   : > { %v490_v56 = vrot.slane %v489_v48, 2  ;;  %v443_v57 = vadd.f32 %v442_v49, %v441_v41  ;;  %v455_v58 = vadd.f32 %v454_v50, %v453_v42  ;;  %v467_v59 = vadd.f32 %v466_v51, %v465_v43 }
  0x3a   : > { %v502_v60 = vrot.slane %v501_v52, 2  ;;  %v420_v61 = vrot.slane %v419_v53, 1  ;;  %v432_v62 = vrot.slane %v431_v54, 1  ;;  %v479_v63 = vadd.f32 %v478_v55, %v477_v47 }
  0x3b   : > { %v491_v0 = vadd.f32 %v490_v56, %v489_v48  ;;  %v444_v1 = vrot.slane %v443_v57, 1  ;;  %v456_v2 = vrot.slane %v455_v58, 1  ;;  %v468_v3 = vrot.slane %v467_v59, 1 }
  0x3c   : > { %v503_v4 = vadd.f32 %v502_v60, %v501_v52  ;;  %v421_v5 = vadd.f32 %v420_v61, %v419_v53  ;;  %v433_v6 = vadd.f32 %v432_v62, %v431_v54  ;;  %v480_v7 = vrot.slane %v479_v63, 1  ;;  %v278_v52 = vld [vmem:[%s1489_s16 + $0xc0] sm:$0xff] }
  0x3d   : > { %v492_v8 = vrot.slane %v491_v0, 1  ;;  %v445_v9 = vadd.f32 %v444_v1, %v443_v57  ;;  %v457_v10 = vadd.f32 %v456_v2, %v455_v58  ;;  %v469_v11 = vadd.f32 %v468_v3, %v467_v59  ;;  %v280_v57 = vld [vmem:[%s1489_s16 + $0xe0] sm:$0xff] }
  0x3e   : > { %v504_v12 = vrot.slane %v503_v4, 1  ;;  %v481_v13 = vadd.f32 %v480_v7, %v479_v63  ;;  %v507_v17 = vadd.f32 %v421_v5, %v1541_v15  ;;  %v509_v18 = vadd.f32 %v433_v6, %v1543_v16  ;;  %v268_v15 = vld [vmem:[%s1489_s16 + $0x20] sm:$0xff] }
  0x3f   : > { %v493_v14 = vadd.f32 %v492_v8, %v491_v0  ;;  %v511_v20 = vadd.f32 %v445_v9, %v1548_v22  ;;  %v513_v21 = vadd.f32 %v457_v10, %v1550_v23  ;;  %v515_v25 = vadd.f32 %v469_v11, %v1552_v24  ;;  %v272_v22 = vld [vmem:[%s1489_s16 + $0x60] sm:$0xff] }
  0x40   : > { %v505_v19 = vadd.f32 %v504_v12, %v503_v4  ;;  %v517_v27 = vadd.f32 %v481_v13, %v1556_v28  ;;  %v523_v31 = vmul.f32 0.0625, %v507_v17  ;;  %v525_v32 = vmul.f32 0.0625, %v509_v18  ;;  %v394_v13 = vld [vmem:[%s1489_s16 + $0x10] sm:$0xff] }
  0x41   : > { %v519_v30 = vadd.f32 %v493_v14, %v1558_v29  ;;  %v527_v35 = vmul.f32 0.0625, %v511_v20  ;;  %v529_v36 = vmul.f32 0.0625, %v513_v21  ;;  %v531_v37 = vmul.f32 0.0625, %v515_v25  ;;  %v398_v20 = vld [vmem:[%s1489_s16 + $0x50] sm:$0xff] }
  0x42   : > { %v521_v16 = vadd.f32 %v505_v19, %v1561_v33  ;;  %v533_v23 = vmul.f32 0.0625, %v517_v27  ;;  %v607_v24 = vsel %vm593_vm0, %v525_v32, %v523_v31  ;;  %v282_v28 = vrot.slane %v266_v26, 4  ;;  %v396_v19 = vld [vmem:[%s1489_s16 + $0x30] sm:$0xff] }
  0x43   : > { %v535_v39 = vmul.f32 0.0625, %v519_v30  ;;  %v608_v29 = vsel %vm595_vm1, %v527_v35, %v607_v24  ;;  %v294_v42 = vrot.slane %v268_v15, 4  ;;  %v306_v43 = vrot.slane %v270_v34, 4  ;;  %v400_v30 = vld [vmem:[%s1489_s16 + $0x70] sm:$0xff] }
  0x44   : > { %v537_v41 = vmul.f32 0.0625, %v521_v16  ;;  %v609_v33 = vsel %vm597_vm2, %v529_v36, %v608_v29  ;;  %v283_v44 = vadd.f32 %v282_v28, %v266_v26  ;;  %v318_v45 = vrot.slane %v272_v22, 4  ;;  %v402_v31 = vld [vmem:[%s1489_s16 + $0x90] sm:$0xff] }
  0x45   : > { %v330_v46 = vrot.slane %v274_v38, 4  ;;  %v610_v47 = vsel %vm599_vm3, %v531_v37, %v609_v33  ;;  %v295_v48 = vadd.f32 %v294_v42, %v268_v15  ;;  %v307_v49 = vadd.f32 %v306_v43, %v270_v34  ;;  %v404_v16 = vld [vmem:[%s1489_s16 + $0xb0] sm:$0xff] }
  0x46   : > { %v342_v50 = vrot.slane %v276_v40, 4  ;;  %v611_v51 = vsel %vm601_vm4, %v533_v23, %v610_v47  ;;  %v284_v53 = vrot.slane %v283_v44, 2  ;;  %v319_v54 = vadd.f32 %v318_v45, %v272_v22  ;;  %v406_v33 = vld [vmem:[%s1489_s16 + $0xd0] sm:$0xff] }
  0x47   : > { %v331_v55 = vadd.f32 %v330_v46, %v274_v38  ;;  %v612_v56 = vsel %vm603_vm5, %v535_v39, %v611_v51  ;;  %v296_v58 = vrot.slane %v295_v48, 2  ;;  %v308_v59 = vrot.slane %v307_v49, 2 }
  0x48   : > { %v343_v60 = vadd.f32 %v342_v50, %v276_v40  ;;  %v613_v61 = vsel %vm605_vm6, %v537_v41, %v612_v56  ;;  %v285_v62 = vadd.f32 %v284_v53, %v283_v44  ;;  %v320_v63 = vrot.slane %v319_v54, 2 }
  0x49   : > { %v332_v0 = vrot.slane %v331_v55, 2  ;;  %680 = vmatprep.mubr.f32.mxu0 %v613_v61  ;;  %791 = vmatprep.mubr.f32.mxu1 %v613_v61  ;;  %v297_v1 = vadd.f32 %v296_v58, %v295_v48  ;;  %v309_v2 = vadd.f32 %v308_v59, %v307_v49  ;;  %v354_v4 = vrot.slane %v278_v52, 4  ;;  %v408_v48 = vld [vmem:[%s1489_s16 + $0xf0] sm:$0xff]  ;;  %s1602_s16 = sand.u32 1, %s1204_s22  }
  0x4a   : > { %v344_v3 = vrot.slane %v343_v60, 2  ;;  %v286_v5 = vrot.slane %v285_v62, 1  ;;  %v321_v6 = vadd.f32 %v320_v63, %v319_v54  ;;  %v366_v8 = vrot.slane %v280_v57, 4  ;;  %s926_s9 = sshll.u32 %s1602_s16, 3 }
  0x4b   : > { %v333_v7 = vadd.f32 %v332_v0, %v331_v55  ;;  %v298_v9 = vrot.slane %v297_v1, 1  ;;  %v310_v10 = vrot.slane %v309_v2, 1  ;;  %v355_v12 = vadd.f32 %v354_v4, %v278_v52  ;;  %s251_s28 = scalar_lea.vmem [#allocation2], %s926_s9  ;;  %s258_s29 = scalar_lea.vmem [#allocation4], %s926_s9 }
  0x4c   : > { %v345_v11 = vadd.f32 %v344_v3, %v343_v60  ;;  %v322_v14 = vrot.slane %v321_v6, 1  ;;  %v367_v18 = vadd.f32 %v366_v8, %v280_v57  ;;  %v287_v21 = vadd.f32 %v286_v5, %v285_v62  ;;  %s818_s26 = sshll.u32 %s251_s28, 4  ;;  %s831_s10 = sshll.u32 %s258_s29, 4  ;;  %s1617_s26 = int_to_ptr.vmem [resolvable:$true] %s818_s26  ;;  %s1624_s10 = int_to_ptr.vmem [resolvable:$true] %s831_s10 }
  0x4d   : > { %v334_v17 = vrot.slane %v333_v7, 1  ;;  %v299_v25 = vadd.f32 %v298_v9, %v297_v1  ;;  %v311_v26 = vadd.f32 %v310_v10, %v309_v2  ;;  %v356_v27 = vrot.slane %v355_v12, 2  ;;  %s800_s9 = scalar_lea.sflag [#allocation3], %s1602_s16  ;;  %s1118_s18 = scalar_lea.vmem %s1617_s26, 128 }
  0x4e   : > { %v323_v32 = vadd.f32 %v322_v14, %v321_v6  ;;  %v346_v15 = vrot.slane %v345_v11, 1  ;;  %v368_v34 = vrot.slane %v367_v18, 2  ;;  %v410_v35 = vrot.slane %v394_v13, 4  ;;  %p1119_p11 = scmp.ne.s32.totalorder %s1617_s26, %s1118_s18  ;;  %p1125_p0 = scmp.lt.s32.totalorder %s1617_s26, %s1123_s20 }
  0x4f   : > { %v335_v36 = vadd.f32 %v334_v17, %v333_v7  ;;  %v357_v37 = vadd.f32 %v356_v27, %v355_v12  ;;  %v422_v22 = vrot.slane %v396_v19, 4  ;;  %v434_v38 = vrot.slane %v398_v20, 4  ;;  %p1126_p1 = scmp.lt.s32.totalorder %s1124_s11, %s1118_s18 }
  0x50   : > { %v369_v23 = vadd.f32 %v368_v34, %v367_v18  ;;  %v411_v39 = vadd.f32 %v410_v35, %v394_v13  ;;  %v446_v24 = vrot.slane %v400_v30, 4  ;;  %v458_v40 = vrot.slane %v402_v31, 4  ;;  %p1120_p12 = pnand %p1119_p11, %p1289_p5 }
  0x51   : > { %v358_v28 = vrot.slane %v357_v37, 1  ;;  %v423_v41 = vadd.f32 %v422_v22, %v396_v19  ;;  %v435_v29 = vadd.f32 %v434_v38, %v398_v20  ;;  %v470_v42 = vrot.slane %v404_v16, 4  ;;  %p1127_p2 = por %p1126_p1, %p1125_p0 }
  0x52   : > { %v347_v43 = vadd.f32 %v346_v15, %v345_v11  ;;  %v412_v44 = vrot.slane %v411_v39, 2  ;;  %v447_v45 = vadd.f32 %v446_v24, %v400_v30  ;;  %v459_v46 = vadd.f32 %v458_v40, %v402_v31  ;;  %p1121_p13 = pneg %p1120_p12 }
  0x53   : > { %v370_v47 = vrot.slane %v369_v23, 1  ;;  %v424_v49 = vrot.slane %v423_v41, 2  ;;  %v436_v50 = vrot.slane %v435_v29, 2  ;;  %v471_v51 = vadd.f32 %v470_v42, %v404_v16 }
  0x54   : > { %v359_v52 = vadd.f32 %v358_v28, %v357_v37  ;;  %v413_v53 = vadd.f32 %v412_v44, %v411_v39  ;;  %v448_v54 = vrot.slane %v447_v45, 2  ;;  %v460_v55 = vrot.slane %v459_v46, 2  ;;  %p1128_p3 = pnand %p1127_p2, %p1121_p13 }
  0x55   : > { %v425_v56 = vadd.f32 %v424_v49, %v423_v41  ;;  %v437_v57 = vadd.f32 %v436_v50, %v435_v29  ;;  %v472_v58 = vrot.slane %v471_v51, 2  ;;  %v482_v59 = vrot.slane %v406_v33, 4  ;;  %v932_v50 = vld [vmem:[%s1691_s4] ss:$0 sm:$0xff] }
  0x56   : > { %v414_v60 = vrot.slane %v413_v53, 1  ;;  %v449_v61 = vadd.f32 %v448_v54, %v447_v45  ;;  %v461_v62 = vadd.f32 %v460_v55, %v459_v46  ;;  %v494_v63 = vrot.slane %v408_v48, 4 }
  0x57   : > { %v426_v0 = vrot.slane %v425_v56, 1  ;;  %v438_v1 = vrot.slane %v437_v57, 1  ;;  %v473_v2 = vadd.f32 %v472_v58, %v471_v51  ;;  %v483_v3 = vadd.f32 %v482_v59, %v406_v33 }
  0x58   : > { %v415_v4 = vadd.f32 %v414_v60, %v413_v53  ;;  %v450_v5 = vrot.slane %v449_v61, 1  ;;  %v462_v6 = vrot.slane %v461_v62, 1  ;;  %v495_v7 = vadd.f32 %v494_v63, %v408_v48  ;;  %v931_v48 = vld [vmem:[%s1689_s2] ss:$0 sm:$0xff] }
  0x59   : > { %v427_v8 = vadd.f32 %v426_v0, %v425_v56  ;;  %v439_v9 = vadd.f32 %v438_v1, %v437_v57  ;;  %v474_v10 = vrot.slane %v473_v2, 1  ;;  %v484_v11 = vrot.slane %v483_v3, 2 }
  0x5a   : > { %v451_v12 = vadd.f32 %v450_v5, %v449_v61  ;;  %v463_v13 = vadd.f32 %v462_v6, %v461_v62  ;;  %v496_v14 = vrot.slane %v495_v7, 2  ;;  %v506_v17 = vadd.f32 %v415_v4, %v287_v21 }
  0x5b   : > { %v475_v18 = vadd.f32 %v474_v10, %v473_v2  ;;  %v485_v19 = vadd.f32 %v484_v11, %v483_v3  ;;  %v508_v20 = vadd.f32 %v427_v8, %v299_v25  ;;  %v510_v27 = vadd.f32 %v439_v9, %v311_v26 }
  0x5c   : > { %v497_v30 = vadd.f32 %v496_v14, %v495_v7  ;;  %v512_v31 = vadd.f32 %v451_v12, %v323_v32  ;;  %v514_v15 = vadd.f32 %v463_v13, %v335_v36  ;;  %v522_v34 = vmul.f32 0.0625, %v506_v17 }
  0x5d   : > { %v486_v16 = vrot.slane %v485_v19, 1  ;;  %v516_v35 = vadd.f32 %v475_v18, %v347_v43  ;;  %v524_v37 = vmul.f32 0.0625, %v508_v20  ;;  %v526_v22 = vmul.f32 0.0625, %v510_v27 }
  0x5e   : > { %v371_v38 = vadd.f32 %v370_v47, %v369_v23  ;;  %v498_v39 = vrot.slane %v497_v30, 1  ;;  %v528_v24 = vmul.f32 0.0625, %v512_v31  ;;  %v530_v40 = vmul.f32 0.0625, %v514_v15 }
  0x5f   : > { %v487_v28 = vadd.f32 %v486_v16, %v485_v19  ;;  %v532_v41 = vmul.f32 0.0625, %v516_v35  ;;  %v594_v21 = vsel %vm593_vm0, %v524_v37, %v522_v34 }
  0x60   : > { %v499_v29 = vadd.f32 %v498_v39, %v497_v30  ;;  %v596_v25 = vsel %vm595_vm1, %v526_v22, %v594_v21 }
  0x61   : > { %v518_v26 = vadd.f32 %v487_v28, %v359_v52  ;;  %v598_v32 = vsel %vm597_vm2, %v528_v24, %v596_v25 }
  0x62   : > { %v520_v36 = vadd.f32 %v499_v29, %v371_v38  ;;  %v600_v42 = vsel %vm599_vm3, %v530_v40, %v598_v32 }
  0x63   : > { %v534_v43 = vmul.f32 0.0625, %v518_v26  ;;  %v602_v23 = vsel %vm601_vm4, %v532_v41, %v600_v42 }
  0x64   : > { %v536_v33 = vmul.f32 0.0625, %v520_v36 }
  0x65   : > { %v604_v44 = vsel %vm603_vm5, %v534_v43, %v602_v23 }
  0x66   : > { %v606_v45 = vsel %vm605_vm6, %v536_v33, %v604_v44 }
  0x67   : > { %681 = vmatmul.mubr.f32.vlgmr.msra.gmra.mrb[0].mxu0 %v606_v45  ;;  %792 = vmatmul.mubr.f32.vlgmr.msra.gmra.mrb[0].mxu1 %v606_v45 }
 0x13a   : > { %v972_v46 = vpop.f32.mrb[0].mxu0  ;;  %v1007_v47 = vpop.f32.mrb[0].mxu1 }
 0x13b   : > { %v973_v49 = vpop.f32.mrb[1].mxu0  ;;  %v1008_v51 = vpop.f32.mrb[1].mxu1 }
 0x13c   : > { %v974_v52 = vadd.f32 %v973_v49, %v972_v46  ;;  %v1009_v53 = vadd.f32 %v1008_v51, %v1007_v47 }
 0x13e   : > { %v683_v54 = vadd.f32 %v974_v52, %v931_v48  ;;  %v794_v55 = vadd.f32 %v1009_v53, %v932_v50 }
 0x140   : > { %687 = vst.msk [vmem:[%s251_s28] sm:$0xff] %vm686_vm7, %v683_v54 }
 0x141   : > { %798 = vst.msk [vmem:[%s258_s29] sm:$0xff] %vm797_vm8, %v794_v55 }
 0x142   : > { %1131 = shalt.err (!%p1128_p3)
}
 0x143   : > { %s1132_s14 = scalar_lea.hbm %s1615_s13, 128  ;;  %s1136_s12 = scalar_lea.hbm %s1692_s5, 256 }
 0x144   : > { %p1133_p4 = scmp.ne.s32.totalorder %s1615_s13, %s1132_s14  ;;  %p1137_p9 = scmp.lt.u32.totalorder %s1615_s13, %s1692_s5 }
 0x145   : > { %p1138_p10 = scmp.lt.u32.totalorder %s1136_s12, %s1132_s14  ;;  %p1140_p12 = scmp.lt.u32.totalorder %s1132_s14, %s1615_s13 }
 0x146   : > { %p1134_p7 = pnand %p1133_p4, %p1289_p5 }
 0x147   : > { %p1139_p11 = por %p1138_p10, %p1137_p9 }
 0x148   : > { %p1135_p8 = pneg %p1134_p7 }
 0x149   : > { %p1141_p13 = por %p1140_p12, %p1139_p11 }
 0x14b   : > { %p1142_p0 = pnand %p1141_p13, %p1135_p8 }
 0x14d   : > { %1145 = shalt.err (!%p1142_p0)
}
 0x14e   : > { %1074 = dma.vmem_to_hbm [thread:$0]  (%p1289_p5), %s1617_s26, 128, %s1615_s13, %s800_s9  }
 0x14f   : > { %s805_s18 = scalar_lea.sflag [#allocation5], %s1602_s16  ;;  %s1146_s19 = scalar_lea.vmem %s1624_s10, 128 }
 0x150   : > { %p1147_p1 = scmp.ne.s32.totalorder %s1624_s10, %s1146_s19  ;;  %s1215_s20 = smov [#allocation4]  }
 0x151   : > { %s1150_s11 = sshll.u32 %s1215_s20, 4  ;;  %s1151_s11 = int_to_ptr.vmem [resolvable:$false] %s1150_s11 }
 0x152   : > { %p1148_p2 = pnand %p1147_p1, %p1289_p5  ;;  %s1152_s14 = scalar_lea.vmem %s1151_s11, 256 }
 0x153   : > { %p1153_p4 = scmp.lt.s32.totalorder %s1624_s10, %s1151_s11  ;;  %p1154_p7 = scmp.lt.s32.totalorder %s1152_s14, %s1146_s19 }
 0x154   : > { %p1149_p3 = pneg %p1148_p2 }
 0x155   : > { %p1155_p8 = por %p1154_p7, %p1153_p4 }
 0x157   : > { %p1156_p9 = pnand %p1155_p8, %p1149_p3 }
 0x159   : > { %1159 = shalt.err (!%p1156_p9)
}
 0x15a   : > { %s1160_s16 = scalar_lea.hbm %s1622_s17, 128  ;;  %s1164_s9 = scalar_lea.hbm %s1693_s6, 256 }
 0x15b   : > { %p1161_p10 = scmp.ne.s32.totalorder %s1622_s17, %s1160_s16  ;;  %p1165_p13 = scmp.lt.u32.totalorder %s1622_s17, %s1693_s6 }
 0x15c   : > { %p1166_p0 = scmp.lt.u32.totalorder %s1164_s9, %s1160_s16  ;;  %p1168_p2 = scmp.lt.u32.totalorder %s1160_s16, %s1622_s17 }
 0x15d   : > { %p1162_p11 = pnand %p1161_p10, %p1289_p5 }
 0x15e   : > { %p1167_p1 = por %p1166_p0, %p1165_p13 }
 0x15f   : > { %p1163_p12 = pneg %p1162_p11 }
 0x160   : > { %p1169_p3 = por %p1168_p2, %p1167_p1 }
 0x162   : > { %p1170_p4 = pnand %p1169_p3, %p1163_p12 }
 0x164   : > { %1173 = shalt.err (!%p1170_p4)
}
 0x165   : > { %1075 = dma.vmem_to_hbm [thread:$0]  (%p1289_p5), %s1624_s10, 128, %s1622_s17, %s805_s18  }
 0x166 PF: > { %p1085_p7 = scmp.ge.s32.totalorder %s1212_s24, 2  ;;  %s843_s12 = sand.u32 1, %s1200_s21  }
 0x167   : > { %s844_s25 = scalar_lea.sflag [#allocation3], %s843_s12 }
 0x168   : > { %p1079_p8 = pnand %p1085_p7, %p1293_p6 }
 0x16a   : > { %1191 = dma.done.wait (!%p1079_p8), %s844_s25, 128  }
 0x16b   : > { %1193 = vsyncadd (!%p1079_p8), %s844_s25, 4294967168  ;;  %s853_s15 = scalar_lea.sflag [#allocation5], %s843_s12 }
 0x16c   : > { %1195 = dma.done.wait (!%p1079_p8), %s853_s15, 128  }
 0x16d   : > { %1197 = vsyncadd (!%p1079_p8), %s853_s15, 4294967168  ;;  %p20_p5 = scmp.ge.s32.totalorder %s1276_s27, 4   ;;  %s1697_s21 = smov %s1204_s22 }
 0x16e   : > { %s1698_s22 = smov %s1208_s23  ;;  %s1699_s23 = smov %s1287_s30 }
 0x16f   : > { %s1700_s24 = smov %s1276_s27  ;;  %22 = sbr.rel (!%p20_p5) target bundleno = 5 (0x5), region = 92 }
 0x176   :  { %858 = vsyncpa [#allocation3], 1 }
 0x177   :  { %860 = vsyncpa [#allocation3 + $0x1], 1 }
 0x178   :  { %861 = vsyncpa [#allocation5], 1 }
 0x179   :  { %863 = vsyncpa [#allocation5 + $0x1], 1 }

// kernel: tpu_custom_call.1
= control target key start
LH: loop header
LB: loop body
LE: loop exit
PB: predicated region body
PF: predicated region fallthrough
CT: control target
= control target key end

     0   :  { %12 = vsyncpa [#allocation3], 0  ;;  %s1687_s0 = inlined_call_operand.vmem [shape: f32[16,16,256], index: 0, kind: input, shape index: {}]   ;;  %s1688_s1 = inlined_call_operand.vmem [shape: f32[256,16], index: 1, kind: input, shape index: {}]   ;;  %s1689_s2 = inlined_call_operand.vmem [shape: f32[1,16], index: 2, kind: input, shape index: {}]   ;;  %s1690_s3 = inlined_call_operand.vmem [shape: f32[256,32], index: 3, kind: input, shape index: {}]   ;;  %s1691_s4 = inlined_call_operand.vmem [shape: f32[1,32], index: 4, kind: input, shape index: {}]   ;;  %s1692_s5 = inlined_call_operand.hbm [shape: f32[16,16], index: 5, kind: output, shape index: {0}]   ;;  %s1693_s6 = inlined_call_operand.hbm [shape: f32[16,32], index: 6, kind: output, shape index: {1}]  }
   0x1   :  { %14 = vsyncpa [#allocation3 + $0x1], 0 }
   0x2   :  { %15 = vsyncpa [#allocation5], 0 }
   0x3   :  { %17 = vsyncpa [#allocation5 + $0x1], 0  ;;  %s1251_s21 = smov 0   ;;  %s1253_s22 = smov 0  }
   0x4   :  { %s1255_s23 = smov 0   ;;  %s1257_s24 = smov 0  }
   0x5 LB: > { %s1272_s25 = sadd.s32 4294967295, %s1212_s24   ;;  %s922_s26 = sadd.s32 4294967294, %s1212_s24   ;;  %s1212_s24 = sphi %s1257_s24, %s1700_s24   ;;  %s1208_s23 = sphi %s1255_s23, %s1699_s23   ;;  %s1204_s22 = sphi %s1253_s22, %s1698_s22   ;;  %s1200_s21 = sphi %s1251_s21, %s1697_s21  }
   0x6   : > { %s1276_s27 = sadd.s32 1, %s1212_s24   ;;  %s140_s28 = sadd.s32 1, %s1208_s23 }
   0x7   : > { %s137_s29 = ssub.s32 %s1212_s24, %s1276_s27  ;;  %p150_p0 = scmp.ne.s32.totalorder %s1208_s23, %s1204_s22 }
   0x8   : > { %p138_p1 = scmp.eq.s32.totalorder %s137_s29, 0  ;;  %p151_p2 = scmp.eq.s32.totalorder %s1272_s25, 1 }
   0x9   : > { %p156_p3 = scmp.ne.s32.totalorder %s1204_s22, %s1200_s21  ;;  %p157_p4 = scmp.eq.s32.totalorder %s922_s26, 1 }
   0xa   : > { %s1287_s30 = scalar_select %p138_p1, %s1208_s23, %s140_s28  }
   0xb   : > { %p1289_p5 = por %p151_p2, %p150_p0  ;;  %p1293_p6 = por %p157_p4, %p156_p3 }
   0xc   : > { %p925_p7 = scmp.ge.s32.totalorder %s1212_s24, 1  ;;  %p223_p8 = scmp.lt.s32.totalorder %s1212_s24, 3 }
   0xe   : > { %p224_p9 = pnand %p925_p7, %p223_p8 }
   0xf   : > { %v554_v0 = vld [vmem:[%s1688_s1 + $0x80] sm:$0xff] (!%p224_p9)  ;;  %v555_v1 = vld [vmem:[%s1688_s1 + $0x88] sm:$0xff] (!%p224_p9)  ;;  %v556_v11 = vld [vmem:[%s1688_s1 + $0x90] sm:$0xff] (!%p224_p9)  ;;  %s928_s9 = sshll.u32 (!%p224_p9), %s1272_s25, 3  ;;  %vm593_vm0 = vcmask (!%p224_p9), 1041409   ;;  %vm595_vm1 = vcmask (!%p224_p9), 1042434  }
  0x10   : > { %227 = sbr.rel (%p224_p9) target bundleno = 358 (0x166), region = 40  ;;  %v704_v2 = vld [vmem:[%s1690_s3 + $0x80] sm:$0xff] (!%p224_p9)  ;;  %v1010_v3 = vpack.c.bf16 (!%p224_p9), %v555_v1, %v554_v0  ;;  %v705_v4 = vld [vmem:[%s1690_s3 + $0x88] sm:$0xff] (!%p224_p9)  ;;  %v557_v13 = vld [vmem:[%s1688_s1 + $0x98] sm:$0xff] (!%p224_p9)  ;;  %p1374_p10 = scmp.lt.s32.totalorder (!%p224_p9), %s928_s9, 15  ;;  %vm597_vm2 = vcmask (!%p224_p9), 1043459  }
  0x11   : > { %v538_v5 = vld [vmem:[%s1688_s1] sm:$0xff] (!%p224_p9)  ;;  %v539_v6 = vld [vmem:[%s1688_s1 + $0x8] sm:$0xff] (!%p224_p9)  ;;  %v1042_v7 = vpack.c.bf16 (!%p224_p9), %v705_v4, %v704_v2  ;;  %v706_v14 = vld [vmem:[%s1690_s3 + $0x90] sm:$0xff] (!%p224_p9)  ;;  %v1014_v16 = vpack.c.bf16 (!%p224_p9), %v557_v13, %v556_v11  ;;  %vm599_vm3 = vcmask (!%p224_p9), 1044484   ;;  %vm601_vm4 = vcmask (!%p224_p9), 1045509   ;;  %s935_s14 = sshll.u32 (!%p224_p9), %s1272_s25, 7 }
  0x12   : > { %v1012_v8 = vpack.c.bf16 (!%p224_p9), %v539_v6, %v538_v5  ;;  %v688_v9 = vld [vmem:[%s1690_s3] sm:$0xff] (!%p224_p9)  ;;  %v689_v10 = vld [vmem:[%s1690_s3 + $0x8] sm:$0xff] (!%p224_p9)  ;;  %1011 = vmatprep.subr.bf16.mxu0 (!%p224_p9), %v1010_v3  ;;  %v707_v15 = vld [vmem:[%s1690_s3 + $0x98] sm:$0xff] (!%p224_p9)  ;;  %vm603_vm5 = vcmask (!%p224_p9), 1046534   ;;  %vm605_vm6 = vcmask (!%p224_p9), 1047559   ;;  %vm686_vm7 = vcmask (!%p224_p9), 130048   ;;  %s1615_s13 = scalar_lea.hbm (!%p224_p9), %s1692_s5, %s935_s14  ;;  %s1622_s17 = scalar_lea.hbm (!%p224_p9), %s1693_s6, %s935_s14 }
  0x13   : > { %v1044_v12 = vpack.c.bf16 (!%p224_p9), %v689_v10, %v688_v9  ;;  %1043 = vmatprep.subr.bf16.mxu1 (!%p224_p9), %v1042_v7  ;;  %v1046_v17 = vpack.c.bf16 (!%p224_p9), %v707_v15, %v706_v14  ;;  %v540_v18 = vld [vmem:[%s1688_s1 + $0x10] sm:$0xff] (!%p224_p9)  ;;  %v541_v19 = vld [vmem:[%s1688_s1 + $0x18] sm:$0xff] (!%p224_p9)  ;;  %v558_v23 = vld [vmem:[%s1688_s1 + $0xa0] sm:$0xff] (!%p224_p9)  ;;  %vm797_vm8 = vcmask (!%p224_p9), 261120   ;;  %s1214_s19 = smov (!%p224_p9), [#allocation2]  }
  0x14   : > { %1013 = vmatpush3.bf16.msra.mxu0 (!%p224_p9), %v1012_v8  ;;  %v690_v20 = vld [vmem:[%s1690_s3 + $0x10] sm:$0xff] (!%p224_p9)  ;;  %v1016_v21 = vpack.c.bf16 (!%p224_p9), %v541_v19, %v540_v18  ;;  %v691_v22 = vld [vmem:[%s1690_s3 + $0x18] sm:$0xff] (!%p224_p9)  ;;  %v559_v24 = vld [vmem:[%s1688_s1 + $0xa8] sm:$0xff] (!%p224_p9)  ;;  %s1122_s20 = sshll.u32 (!%p224_p9), %s1214_s19, 4  ;;  %s1123_s20 = int_to_ptr.vmem [resolvable:$false] %s1122_s20 }
  0x15   : > { %1045 = vmatpush3.bf16.msra.mxu1 (!%p224_p9), %v1044_v12  ;;  %1015 = vmatprep.subr.bf16.mxu0 (!%p224_p9), %v1014_v16  ;;  %v1048_v25 = vpack.c.bf16 (!%p224_p9), %v691_v22, %v690_v20  ;;  %v1018_v26 = vpack.c.bf16 (!%p224_p9), %v559_v24, %v558_v23  ;;  %v708_v27 = vld [vmem:[%s1690_s3 + $0xa0] sm:$0xff] (!%p224_p9)  ;;  %v709_v28 = vld [vmem:[%s1690_s3 + $0xa8] sm:$0xff] (!%p224_p9)  ;;  %v560_v35 = vld [vmem:[%s1688_s1 + $0xb0] sm:$0xff] (!%p224_p9)  ;;  %s1124_s11 = scalar_lea.vmem (!%p224_p9), %s1123_s20, 256 }
  0x16   : > { %1047 = vmatprep.subr.bf16.mxu1 (!%p224_p9), %v1046_v17  ;;  %v542_v29 = vld [vmem:[%s1688_s1 + $0x20] sm:$0xff] (!%p224_p9)  ;;  %v1050_v30 = vpack.c.bf16 (!%p224_p9), %v709_v28, %v708_v27  ;;  %v543_v31 = vld [vmem:[%s1688_s1 + $0x28] sm:$0xff] (!%p224_p9)  ;;  %v561_v36 = vld [vmem:[%s1688_s1 + $0xb8] sm:$0xff] (!%p224_p9) }
  0x17   : > { %v692_v32 = vld [vmem:[%s1690_s3 + $0x20] sm:$0xff]  ;;  %v693_v33 = vld [vmem:[%s1690_s3 + $0x28] sm:$0xff]  ;;  %v1020_v34 = vpack.c.bf16 %v543_v31, %v542_v29  ;;  %v710_v37 = vld [vmem:[%s1690_s3 + $0xb0] sm:$0xff]  ;;  %v1022_v39 = vpack.c.bf16 %v561_v36, %v560_v35  ;;  %s1702_s9 = smov (!%p1374_p10, %s928_s9), 15 }
  0x18   : > { %1017 = vmatpush3.bf16.msra.mxu0 %v1016_v21  ;;  %v1052_v38 = vpack.c.bf16 %v693_v33, %v692_v32  ;;  %v711_v40 = vld [vmem:[%s1690_s3 + $0xb8] sm:$0xff]  ;;  %v544_v41 = vld [vmem:[%s1688_s1 + $0x30] sm:$0xff]  ;;  %v562_v46 = vld [vmem:[%s1688_s1 + $0xc0] sm:$0xff]  ;;  %s939_s28 = sshll.u32 %s1702_s9, 5 }
  0x19   : > { %1049 = vmatpush3.bf16.msra.mxu1 %v1048_v25  ;;  %1019 = vmatprep.subr.bf16.mxu0 %v1018_v26  ;;  %v545_v42 = vld [vmem:[%s1688_s1 + $0x38] sm:$0xff]  ;;  %v1054_v43 = vpack.c.bf16 %v711_v40, %v710_v37  ;;  %v694_v44 = vld [vmem:[%s1690_s3 + $0x30] sm:$0xff]  ;;  %v563_v47 = vld [vmem:[%s1688_s1 + $0xc8] sm:$0xff]  ;;  %s1489_s16 = scalar_lea.vmem %s1687_s0, %s939_s28 }
  0x1a   : > { %1051 = vmatprep.subr.bf16.mxu1 %v1050_v30  ;;  %v695_v45 = vld [vmem:[%s1690_s3 + $0x38] sm:$0xff]  ;;  %v712_v48 = vld [vmem:[%s1690_s3 + $0xc0] sm:$0xff]  ;;  %v713_v49 = vld [vmem:[%s1690_s3 + $0xc8] sm:$0xff]  ;;  %v1024_v50 = vpack.c.bf16 %v545_v42, %v544_v41  ;;  %v1026_v54 = vpack.c.bf16 %v563_v47, %v562_v46 }
  0x1b   : > { %v546_v51 = vld [vmem:[%s1688_s1 + $0x40] sm:$0xff]  ;;  %v547_v52 = vld [vmem:[%s1688_s1 + $0x48] sm:$0xff]  ;;  %v1056_v53 = vpack.c.bf16 %v695_v45, %v694_v44  ;;  %v564_v57 = vld [vmem:[%s1688_s1 + $0xd0] sm:$0xff]  ;;  %v1058_v58 = vpack.c.bf16 %v713_v49, %v712_v48 }
  0x1c   : > { %1021 = vmatpush3.bf16.msra.mxu0 %v1020_v34  ;;  %v696_v55 = vld [vmem:[%s1690_s3 + $0x40] sm:$0xff]  ;;  %v697_v56 = vld [vmem:[%s1690_s3 + $0x48] sm:$0xff]  ;;  %v565_v59 = vld [vmem:[%s1688_s1 + $0xd8] sm:$0xff]  ;;  %v1028_v2 = vpack.c.bf16 %v547_v52, %v546_v51 }
  0x1d   : > { %1053 = vmatpush3.bf16.msra.mxu1 %v1052_v38  ;;  %1023 = vmatprep.subr.bf16.mxu0 %v1022_v39  ;;  %v714_v60 = vld [vmem:[%s1690_s3 + $0xd0] sm:$0xff]  ;;  %v715_v61 = vld [vmem:[%s1690_s3 + $0xd8] sm:$0xff]  ;;  %v566_v3 = vld [vmem:[%s1688_s1 + $0xe0] sm:$0xff]  ;;  %v1060_v6 = vpack.c.bf16 %v697_v56, %v696_v55  ;;  %v1030_v7 = vpack.c.bf16 %v565_v59, %v564_v57 }
  0x1e   : > { %1055 = vmatprep.subr.bf16.mxu1 %v1054_v43  ;;  %v548_v62 = vld [vmem:[%s1688_s1 + $0x50] sm:$0xff]  ;;  %v549_v63 = vld [vmem:[%s1688_s1 + $0x58] sm:$0xff]  ;;  %v567_v4 = vld [vmem:[%s1688_s1 + $0xe8] sm:$0xff]  ;;  %v1062_v11 = vpack.c.bf16 %v715_v61, %v714_v60 }
  0x1f   : > { %v698_v0 = vld [vmem:[%s1690_s3 + $0x50] sm:$0xff]  ;;  %v699_v1 = vld [vmem:[%s1690_s3 + $0x58] sm:$0xff]  ;;  %v716_v5 = vld [vmem:[%s1690_s3 + $0xe0] sm:$0xff]  ;;  %v1032_v18 = vpack.c.bf16 %v549_v63, %v548_v62  ;;  %v1034_v20 = vpack.c.bf16 %v567_v4, %v566_v3 }
  0x20   : > { %1025 = vmatpush3.bf16.msra.mxu0 %v1024_v50  ;;  %v717_v8 = vld [vmem:[%s1690_s3 + $0xe8] sm:$0xff]  ;;  %v550_v9 = vld [vmem:[%s1688_s1 + $0x60] sm:$0xff]  ;;  %v568_v14 = vld [vmem:[%s1688_s1 + $0xf0] sm:$0xff]  ;;  %v1064_v19 = vpack.c.bf16 %v699_v1, %v698_v0 }
  0x21   : > { %1057 = vmatpush3.bf16.msra.mxu1 %v1056_v53  ;;  %1027 = vmatprep.subr.bf16.mxu0 %v1026_v54  ;;  %v551_v10 = vld [vmem:[%s1688_s1 + $0x68] sm:$0xff]  ;;  %v1478_v12 = vld [vmem:[%s1690_s3 + $0x60] sm:$0xff]  ;;  %v569_v15 = vld [vmem:[%s1688_s1 + $0xf8] sm:$0xff]  ;;  %v1066_v21 = vpack.c.bf16 %v717_v8, %v716_v5 }
  0x22   : > { %1059 = vmatprep.subr.bf16.mxu1 %v1058_v58  ;;  %v701_v13 = vld [vmem:[%s1690_s3 + $0x68] sm:$0xff]  ;;  %v1497_v16 = vld [vmem:[%s1690_s3 + $0xf0] sm:$0xff]  ;;  %v1502_v17 = vld [vmem:[%s1690_s3 + $0xf8] sm:$0xff]  ;;  %v1036_v25 = vpack.c.bf16 %v551_v10, %v550_v9  ;;  %v1038_v27 = vpack.c.bf16 %v569_v15, %v568_v14 }
  0x23   : > { %v1507_v22 = vld [vmem:[%s1688_s1 + $0x70] sm:$0xff]  ;;  %v1512_v23 = vld [vmem:[%s1688_s1 + $0x78] sm:$0xff]  ;;  %v1068_v26 = vpack.c.bf16 %v701_v13, %v1478_v12  ;;  %v267_v29 = vld [vmem:[%s1489_s16 + $0x8] sm:$0xff]  ;;  %v1070_v31 = vpack.c.bf16 %v1502_v17, %v1497_v16 }
  0x24   : > { %1029 = vmatpush3.bf16.msra.mxu0 %v1028_v2  ;;  %v1517_v24 = vld [vmem:[%s1690_s3 + $0x70] sm:$0xff]  ;;  %v1523_v28 = vld [vmem:[%s1690_s3 + $0x78] sm:$0xff]  ;;  %v269_v30 = vld [vmem:[%s1489_s16 + $0x28] sm:$0xff]  ;;  %v1040_v32 = vpack.c.bf16 %v1512_v23, %v1507_v22  ;;  %v288_v36 = vrot.slane %v267_v29, 4 }
  0x25   : > { %1061 = vmatpush3.bf16.msra.mxu1 %v1060_v6  ;;  %1031 = vmatprep.subr.bf16.mxu0 %v1030_v7  ;;  %v271_v33 = vld [vmem:[%s1489_s16 + $0x48] sm:$0xff]  ;;  %v300_v37 = vrot.slane %v269_v30, 4  ;;  %v1072_v38 = vpack.c.bf16 %v1523_v28, %v1517_v24  ;;  %v395_v13 = vld [vmem:[%s1489_s16 + $0x18] sm:$0xff] }
  0x26   : > { %1063 = vmatprep.subr.bf16.mxu1 %v1062_v11  ;;  %v273_v34 = vld [vmem:[%s1489_s16 + $0x68] sm:$0xff]  ;;  %v312_v42 = vrot.slane %v271_v33, 4  ;;  %v289_v45 = vadd.f32 %v288_v36, %v267_v29  ;;  %v397_v14 = vld [vmem:[%s1489_s16 + $0x38] sm:$0xff] }
  0x27   : > { %v275_v35 = vld [vmem:[%s1489_s16 + $0x88] sm:$0xff]  ;;  %v324_v43 = vrot.slane %v273_v34, 4  ;;  %v301_v46 = vadd.f32 %v300_v37, %v269_v30  ;;  %v409_v30 = vld [vmem:[%s1489_s16 + $0xf8] sm:$0xff] }
  0x28   : > { %v277_v39 = vld [vmem:[%s1489_s16 + $0xa8] sm:$0xff]  ;;  %v336_v44 = vrot.slane %v275_v35, 4  ;;  %1033 = vmatpush3.bf16.msra.mxu0 %v1032_v18  ;;  %v313_v49 = vadd.f32 %v312_v42, %v271_v33  ;;  %v290_v53 = vrot.slane %v289_v45, 2 }
  0x29   : > { %v279_v40 = vld [vmem:[%s1489_s16 + $0xc8] sm:$0xff]  ;;  %v348_v47 = vrot.slane %v277_v39, 4  ;;  %1065 = vmatpush3.bf16.msra.mxu1 %v1064_v19  ;;  %1035 = vmatprep.subr.bf16.mxu0 %v1034_v20  ;;  %v325_v50 = vadd.f32 %v324_v43, %v273_v34  ;;  %v302_v54 = vrot.slane %v301_v46, 2  ;;  %v399_v19 = vld [vmem:[%s1489_s16 + $0x58] sm:$0xff] }
  0x2a   : > { %v281_v41 = vld [vmem:[%s1489_s16 + $0xe8] sm:$0xff]  ;;  %v360_v48 = vrot.slane %v279_v40, 4  ;;  %v337_v51 = vadd.f32 %v336_v44, %v275_v35  ;;  %1067 = vmatprep.subr.bf16.mxu1 %v1066_v21  ;;  %v314_v57 = vrot.slane %v313_v49, 2  ;;  %v291_v61 = vadd.f32 %v290_v53, %v289_v45  ;;  %v401_v20 = vld [vmem:[%s1489_s16 + $0x78] sm:$0xff] }
  0x2b   : > { %v372_v52 = vrot.slane %v281_v41, 4  ;;  %v349_v55 = vadd.f32 %v348_v47, %v277_v39  ;;  %v326_v58 = vrot.slane %v325_v50, 2  ;;  %v303_v62 = vadd.f32 %v302_v54, %v301_v46  ;;  %v403_v21 = vld [vmem:[%s1489_s16 + $0x98] sm:$0xff] }
  0x2c   : > { %v361_v56 = vadd.f32 %v360_v48, %v279_v40  ;;  %v338_v59 = vrot.slane %v337_v51, 2  ;;  %1037 = vmatpush3.bf16.msra.mxu0 %v1036_v25  ;;  %v315_v1 = vadd.f32 %v314_v57, %v313_v49  ;;  %v292_v5 = vrot.slane %v291_v61, 1 }
  0x2d   : > { %v373_v60 = vadd.f32 %v372_v52, %v281_v41  ;;  %v350_v63 = vrot.slane %v349_v55, 2  ;;  %1069 = vmatpush3.bf16.msra.mxu1 %v1068_v26  ;;  %1039 = vmatprep.subr.bf16.mxu0 %v1038_v27  ;;  %v327_v2 = vadd.f32 %v326_v58, %v325_v50  ;;  %v304_v6 = vrot.slane %v303_v62, 1  ;;  %v405_v26 = vld [vmem:[%s1489_s16 + $0xb8] sm:$0xff] }
  0x2e   : > { %v362_v0 = vrot.slane %v361_v56, 2  ;;  %v339_v3 = vadd.f32 %v338_v59, %v337_v51  ;;  %1071 = vmatprep.subr.bf16.mxu1 %v1070_v31  ;;  %v316_v9 = vrot.slane %v315_v1, 1  ;;  %v1541_v15 = vadd.f32 %v292_v5, %v291_v61  ;;  %v407_v27 = vld [vmem:[%s1489_s16 + $0xd8] sm:$0xff] }
  0x2f   : > { %v374_v4 = vrot.slane %v373_v60, 2  ;;  %v351_v7 = vadd.f32 %v350_v63, %v349_v55  ;;  %v328_v10 = vrot.slane %v327_v2, 1  ;;  %v1543_v16 = vadd.f32 %v304_v6, %v303_v62 }
  0x30   : > { %v363_v8 = vadd.f32 %v362_v0, %v361_v56  ;;  %v340_v11 = vrot.slane %v339_v3, 1  ;;  %1041 = vmatpush3.bf16.msra.mxu0 %v1040_v32  ;;  %v1548_v22 = vadd.f32 %v316_v9, %v315_v1  ;;  %v416_v31 = vrot.slane %v395_v13, 4 }
  0x31   : > { %v375_v12 = vadd.f32 %v374_v4, %v373_v60  ;;  %v352_v17 = vrot.slane %v351_v7, 1  ;;  %1073 = vmatpush3.bf16.msra.mxu1 %v1072_v38  ;;  %v1550_v23 = vadd.f32 %v328_v10, %v327_v2  ;;  %v428_v32 = vrot.slane %v397_v14, 4 }
  0x32   : > { %v364_v18 = vrot.slane %v363_v8, 1  ;;  %v1552_v24 = vadd.f32 %v340_v11, %v339_v3  ;;  %v440_v34 = vrot.slane %v399_v19, 4  ;;  %v452_v35 = vrot.slane %v401_v20, 4 }
  0x33   : > { %v376_v25 = vrot.slane %v375_v12, 1  ;;  %v1556_v28 = vadd.f32 %v352_v17, %v351_v7  ;;  %v464_v36 = vrot.slane %v403_v21, 4  ;;  %v417_v37 = vadd.f32 %v416_v31, %v395_v13 }
  0x34   : > { %v1558_v29 = vadd.f32 %v364_v18, %v363_v8  ;;  %v429_v38 = vadd.f32 %v428_v32, %v397_v14  ;;  %v476_v39 = vrot.slane %v405_v26, 4  ;;  %v488_v40 = vrot.slane %v407_v27, 4 }
  0x35   : > { %v1561_v33 = vadd.f32 %v376_v25, %v375_v12  ;;  %v441_v41 = vadd.f32 %v440_v34, %v399_v19  ;;  %v453_v42 = vadd.f32 %v452_v35, %v401_v20  ;;  %v465_v43 = vadd.f32 %v464_v36, %v403_v21  ;;  %v270_v34 = vld [vmem:[%s1489_s16 + $0x40] sm:$0xff] }
  0x36   : > { %v500_v44 = vrot.slane %v409_v30, 4  ;;  %v418_v45 = vrot.slane %v417_v37, 2  ;;  %v430_v46 = vrot.slane %v429_v38, 2  ;;  %v477_v47 = vadd.f32 %v476_v39, %v405_v26  ;;  %v266_v26 = vld [vmem:[%s1489_s16] sm:$0xff] }
  0x37   : > { %v489_v48 = vadd.f32 %v488_v40, %v407_v27  ;;  %v442_v49 = vrot.slane %v441_v41, 2  ;;  %v454_v50 = vrot.slane %v453_v42, 2  ;;  %v466_v51 = vrot.slane %v465_v43, 2  ;;  %v276_v40 = vld [vmem:[%s1489_s16 + $0xa0] sm:$0xff] }
  0x38   : > { %v501_v52 = vadd.f32 %v500_v44, %v409_v30  ;;  %v419_v53 = vadd.f32 %v418_v45, %v417_v37  ;;  %v431_v54 = vadd.f32 %v430_v46, %v429_v38  ;;  %v478_v55 = vrot.slane %v477_v47, 2  ;;  %v274_v38 = vld [vmem:[%s1489_s16 + $0x80] sm:$0xff] }
  0x39   : > { %v490_v56 = vrot.slane %v489_v48, 2  ;;  %v443_v57 = vadd.f32 %v442_v49, %v441_v41  ;;  %v455_v58 = vadd.f32 %v454_v50, %v453_v42  ;;  %v467_v59 = vadd.f32 %v466_v51, %v465_v43 }
  0x3a   : > { %v502_v60 = vrot.slane %v501_v52, 2  ;;  %v420_v61 = vrot.slane %v419_v53, 1  ;;  %v432_v62 = vrot.slane %v431_v54, 1  ;;  %v479_v63 = vadd.f32 %v478_v55, %v477_v47 }
  0x3b   : > { %v491_v0 = vadd.f32 %v490_v56, %v489_v48  ;;  %v444_v1 = vrot.slane %v443_v57, 1  ;;  %v456_v2 = vrot.slane %v455_v58, 1  ;;  %v468_v3 = vrot.slane %v467_v59, 1 }
  0x3c   : > { %v503_v4 = vadd.f32 %v502_v60, %v501_v52  ;;  %v421_v5 = vadd.f32 %v420_v61, %v419_v53  ;;  %v433_v6 = vadd.f32 %v432_v62, %v431_v54  ;;  %v480_v7 = vrot.slane %v479_v63, 1  ;;  %v278_v52 = vld [vmem:[%s1489_s16 + $0xc0] sm:$0xff] }
  0x3d   : > { %v492_v8 = vrot.slane %v491_v0, 1  ;;  %v445_v9 = vadd.f32 %v444_v1, %v443_v57  ;;  %v457_v10 = vadd.f32 %v456_v2, %v455_v58  ;;  %v469_v11 = vadd.f32 %v468_v3, %v467_v59  ;;  %v280_v57 = vld [vmem:[%s1489_s16 + $0xe0] sm:$0xff] }
  0x3e   : > { %v504_v12 = vrot.slane %v503_v4, 1  ;;  %v481_v13 = vadd.f32 %v480_v7, %v479_v63  ;;  %v507_v17 = vadd.f32 %v421_v5, %v1541_v15  ;;  %v509_v18 = vadd.f32 %v433_v6, %v1543_v16  ;;  %v268_v15 = vld [vmem:[%s1489_s16 + $0x20] sm:$0xff] }
  0x3f   : > { %v493_v14 = vadd.f32 %v492_v8, %v491_v0  ;;  %v511_v20 = vadd.f32 %v445_v9, %v1548_v22  ;;  %v513_v21 = vadd.f32 %v457_v10, %v1550_v23  ;;  %v515_v25 = vadd.f32 %v469_v11, %v1552_v24  ;;  %v272_v22 = vld [vmem:[%s1489_s16 + $0x60] sm:$0xff] }
  0x40   : > { %v505_v19 = vadd.f32 %v504_v12, %v503_v4  ;;  %v517_v27 = vadd.f32 %v481_v13, %v1556_v28  ;;  %v523_v31 = vmul.f32 0.0625, %v507_v17  ;;  %v525_v32 = vmul.f32 0.0625, %v509_v18  ;;  %v394_v13 = vld [vmem:[%s1489_s16 + $0x10] sm:$0xff] }
  0x41   : > { %v519_v30 = vadd.f32 %v493_v14, %v1558_v29  ;;  %v527_v35 = vmul.f32 0.0625, %v511_v20  ;;  %v529_v36 = vmul.f32 0.0625, %v513_v21  ;;  %v531_v37 = vmul.f32 0.0625, %v515_v25  ;;  %v398_v20 = vld [vmem:[%s1489_s16 + $0x50] sm:$0xff] }
  0x42   : > { %v521_v16 = vadd.f32 %v505_v19, %v1561_v33  ;;  %v533_v23 = vmul.f32 0.0625, %v517_v27  ;;  %v607_v24 = vsel %vm593_vm0, %v525_v32, %v523_v31  ;;  %v282_v28 = vrot.slane %v266_v26, 4  ;;  %v396_v19 = vld [vmem:[%s1489_s16 + $0x30] sm:$0xff] }
  0x43   : > { %v535_v39 = vmul.f32 0.0625, %v519_v30  ;;  %v608_v29 = vsel %vm595_vm1, %v527_v35, %v607_v24  ;;  %v294_v42 = vrot.slane %v268_v15, 4  ;;  %v306_v43 = vrot.slane %v270_v34, 4  ;;  %v400_v30 = vld [vmem:[%s1489_s16 + $0x70] sm:$0xff] }
  0x44   : > { %v537_v41 = vmul.f32 0.0625, %v521_v16  ;;  %v609_v33 = vsel %vm597_vm2, %v529_v36, %v608_v29  ;;  %v283_v44 = vadd.f32 %v282_v28, %v266_v26  ;;  %v318_v45 = vrot.slane %v272_v22, 4  ;;  %v402_v31 = vld [vmem:[%s1489_s16 + $0x90] sm:$0xff] }
  0x45   : > { %v330_v46 = vrot.slane %v274_v38, 4  ;;  %v610_v47 = vsel %vm599_vm3, %v531_v37, %v609_v33  ;;  %v295_v48 = vadd.f32 %v294_v42, %v268_v15  ;;  %v307_v49 = vadd.f32 %v306_v43, %v270_v34  ;;  %v404_v16 = vld [vmem:[%s1489_s16 + $0xb0] sm:$0xff] }
  0x46   : > { %v342_v50 = vrot.slane %v276_v40, 4  ;;  %v611_v51 = vsel %vm601_vm4, %v533_v23, %v610_v47  ;;  %v284_v53 = vrot.slane %v283_v44, 2  ;;  %v319_v54 = vadd.f32 %v318_v45, %v272_v22  ;;  %v406_v33 = vld [vmem:[%s1489_s16 + $0xd0] sm:$0xff] }
  0x47   : > { %v331_v55 = vadd.f32 %v330_v46, %v274_v38  ;;  %v612_v56 = vsel %vm603_vm5, %v535_v39, %v611_v51  ;;  %v296_v58 = vrot.slane %v295_v48, 2  ;;  %v308_v59 = vrot.slane %v307_v49, 2 }
  0x48   : > { %v343_v60 = vadd.f32 %v342_v50, %v276_v40  ;;  %v613_v61 = vsel %vm605_vm6, %v537_v41, %v612_v56  ;;  %v285_v62 = vadd.f32 %v284_v53, %v283_v44  ;;  %v320_v63 = vrot.slane %v319_v54, 2 }
  0x49   : > { %v332_v0 = vrot.slane %v331_v55, 2  ;;  %680 = vmatprep.mubr.f32.mxu0 %v613_v61  ;;  %791 = vmatprep.mubr.f32.mxu1 %v613_v61  ;;  %v297_v1 = vadd.f32 %v296_v58, %v295_v48  ;;  %v309_v2 = vadd.f32 %v308_v59, %v307_v49  ;;  %v354_v4 = vrot.slane %v278_v52, 4  ;;  %v408_v48 = vld [vmem:[%s1489_s16 + $0xf0] sm:$0xff]  ;;  %s1602_s16 = sand.u32 1, %s1204_s22  }
  0x4a   : > { %v344_v3 = vrot.slane %v343_v60, 2  ;;  %v286_v5 = vrot.slane %v285_v62, 1  ;;  %v321_v6 = vadd.f32 %v320_v63, %v319_v54  ;;  %v366_v8 = vrot.slane %v280_v57, 4  ;;  %s926_s9 = sshll.u32 %s1602_s16, 3 }
  0x4b   : > { %v333_v7 = vadd.f32 %v332_v0, %v331_v55  ;;  %v298_v9 = vrot.slane %v297_v1, 1  ;;  %v310_v10 = vrot.slane %v309_v2, 1  ;;  %v355_v12 = vadd.f32 %v354_v4, %v278_v52  ;;  %s251_s28 = scalar_lea.vmem [#allocation2], %s926_s9  ;;  %s258_s29 = scalar_lea.vmem [#allocation4], %s926_s9 }
  0x4c   : > { %v345_v11 = vadd.f32 %v344_v3, %v343_v60  ;;  %v322_v14 = vrot.slane %v321_v6, 1  ;;  %v367_v18 = vadd.f32 %v366_v8, %v280_v57  ;;  %v287_v21 = vadd.f32 %v286_v5, %v285_v62  ;;  %s818_s26 = sshll.u32 %s251_s28, 4  ;;  %s831_s10 = sshll.u32 %s258_s29, 4  ;;  %s1617_s26 = int_to_ptr.vmem [resolvable:$true] %s818_s26  ;;  %s1624_s10 = int_to_ptr.vmem [resolvable:$true] %s831_s10 }
  0x4d   : > { %v334_v17 = vrot.slane %v333_v7, 1  ;;  %v299_v25 = vadd.f32 %v298_v9, %v297_v1  ;;  %v311_v26 = vadd.f32 %v310_v10, %v309_v2  ;;  %v356_v27 = vrot.slane %v355_v12, 2  ;;  %s800_s9 = scalar_lea.sflag [#allocation3], %s1602_s16  ;;  %s1118_s18 = scalar_lea.vmem %s1617_s26, 128 }
  0x4e   : > { %v323_v32 = vadd.f32 %v322_v14, %v321_v6  ;;  %v346_v15 = vrot.slane %v345_v11, 1  ;;  %v368_v34 = vrot.slane %v367_v18, 2  ;;  %v410_v35 = vrot.slane %v394_v13, 4  ;;  %p1119_p11 = scmp.ne.s32.totalorder %s1617_s26, %s1118_s18  ;;  %p1125_p0 = scmp.lt.s32.totalorder %s1617_s26, %s1123_s20 }
  0x4f   : > { %v335_v36 = vadd.f32 %v334_v17, %v333_v7  ;;  %v357_v37 = vadd.f32 %v356_v27, %v355_v12  ;;  %v422_v22 = vrot.slane %v396_v19, 4  ;;  %v434_v38 = vrot.slane %v398_v20, 4  ;;  %p1126_p1 = scmp.lt.s32.totalorder %s1124_s11, %s1118_s18 }
  0x50   : > { %v369_v23 = vadd.f32 %v368_v34, %v367_v18  ;;  %v411_v39 = vadd.f32 %v410_v35, %v394_v13  ;;  %v446_v24 = vrot.slane %v400_v30, 4  ;;  %v458_v40 = vrot.slane %v402_v31, 4  ;;  %p1120_p12 = pnand %p1119_p11, %p1289_p5 }
  0x51   : > { %v358_v28 = vrot.slane %v357_v37, 1  ;;  %v423_v41 = vadd.f32 %v422_v22, %v396_v19  ;;  %v435_v29 = vadd.f32 %v434_v38, %v398_v20  ;;  %v470_v42 = vrot.slane %v404_v16, 4  ;;  %p1127_p2 = por %p1126_p1, %p1125_p0 }
  0x52   : > { %v347_v43 = vadd.f32 %v346_v15, %v345_v11  ;;  %v412_v44 = vrot.slane %v411_v39, 2  ;;  %v447_v45 = vadd.f32 %v446_v24, %v400_v30  ;;  %v459_v46 = vadd.f32 %v458_v40, %v402_v31  ;;  %p1121_p13 = pneg %p1120_p12 }
  0x53   : > { %v370_v47 = vrot.slane %v369_v23, 1  ;;  %v424_v49 = vrot.slane %v423_v41, 2  ;;  %v436_v50 = vrot.slane %v435_v29, 2  ;;  %v471_v51 = vadd.f32 %v470_v42, %v404_v16 }
  0x54   : > { %v359_v52 = vadd.f32 %v358_v28, %v357_v37  ;;  %v413_v53 = vadd.f32 %v412_v44, %v411_v39  ;;  %v448_v54 = vrot.slane %v447_v45, 2  ;;  %v460_v55 = vrot.slane %v459_v46, 2  ;;  %p1128_p3 = pnand %p1127_p2, %p1121_p13 }
  0x55   : > { %v425_v56 = vadd.f32 %v424_v49, %v423_v41  ;;  %v437_v57 = vadd.f32 %v436_v50, %v435_v29  ;;  %v472_v58 = vrot.slane %v471_v51, 2  ;;  %v482_v59 = vrot.slane %v406_v33, 4  ;;  %v932_v50 = vld [vmem:[%s1691_s4] ss:$0 sm:$0xff] }
  0x56   : > { %v414_v60 = vrot.slane %v413_v53, 1  ;;  %v449_v61 = vadd.f32 %v448_v54, %v447_v45  ;;  %v461_v62 = vadd.f32 %v460_v55, %v459_v46  ;;  %v494_v63 = vrot.slane %v408_v48, 4 }
  0x57   : > { %v426_v0 = vrot.slane %v425_v56, 1  ;;  %v438_v1 = vrot.slane %v437_v57, 1  ;;  %v473_v2 = vadd.f32 %v472_v58, %v471_v51  ;;  %v483_v3 = vadd.f32 %v482_v59, %v406_v33 }
  0x58   : > { %v415_v4 = vadd.f32 %v414_v60, %v413_v53  ;;  %v450_v5 = vrot.slane %v449_v61, 1  ;;  %v462_v6 = vrot.slane %v461_v62, 1  ;;  %v495_v7 = vadd.f32 %v494_v63, %v408_v48  ;;  %v931_v48 = vld [vmem:[%s1689_s2] ss:$0 sm:$0xff] }
  0x59   : > { %v427_v8 = vadd.f32 %v426_v0, %v425_v56  ;;  %v439_v9 = vadd.f32 %v438_v1, %v437_v57  ;;  %v474_v10 = vrot.slane %v473_v2, 1  ;;  %v484_v11 = vrot.slane %v483_v3, 2 }
  0x5a   : > { %v451_v12 = vadd.f32 %v450_v5, %v449_v61  ;;  %v463_v13 = vadd.f32 %v462_v6, %v461_v62  ;;  %v496_v14 = vrot.slane %v495_v7, 2  ;;  %v506_v17 = vadd.f32 %v415_v4, %v287_v21 }
  0x5b   : > { %v475_v18 = vadd.f32 %v474_v10, %v473_v2  ;;  %v485_v19 = vadd.f32 %v484_v11, %v483_v3  ;;  %v508_v20 = vadd.f32 %v427_v8, %v299_v25  ;;  %v510_v27 = vadd.f32 %v439_v9, %v311_v26 }
  0x5c   : > { %v497_v30 = vadd.f32 %v496_v14, %v495_v7  ;;  %v512_v31 = vadd.f32 %v451_v12, %v323_v32  ;;  %v514_v15 = vadd.f32 %v463_v13, %v335_v36  ;;  %v522_v34 = vmul.f32 0.0625, %v506_v17 }
  0x5d   : > { %v486_v16 = vrot.slane %v485_v19, 1  ;;  %v516_v35 = vadd.f32 %v475_v18, %v347_v43  ;;  %v524_v37 = vmul.f32 0.0625, %v508_v20  ;;  %v526_v22 = vmul.f32 0.0625, %v510_v27 }
  0x5e   : > { %v371_v38 = vadd.f32 %v370_v47, %v369_v23  ;;  %v498_v39 = vrot.slane %v497_v30, 1  ;;  %v528_v24 = vmul.f32 0.0625, %v512_v31  ;;  %v530_v40 = vmul.f32 0.0625, %v514_v15 }
  0x5f   : > { %v487_v28 = vadd.f32 %v486_v16, %v485_v19  ;;  %v532_v41 = vmul.f32 0.0625, %v516_v35  ;;  %v594_v21 = vsel %vm593_vm0, %v524_v37, %v522_v34 }
  0x60   : > { %v499_v29 = vadd.f32 %v498_v39, %v497_v30  ;;  %v596_v25 = vsel %vm595_vm1, %v526_v22, %v594_v21 }
  0x61   : > { %v518_v26 = vadd.f32 %v487_v28, %v359_v52  ;;  %v598_v32 = vsel %vm597_vm2, %v528_v24, %v596_v25 }
  0x62   : > { %v520_v36 = vadd.f32 %v499_v29, %v371_v38  ;;  %v600_v42 = vsel %vm599_vm3, %v530_v40, %v598_v32 }
  0x63   : > { %v534_v43 = vmul.f32 0.0625, %v518_v26  ;;  %v602_v23 = vsel %vm601_vm4, %v532_v41, %v600_v42 }
  0x64   : > { %v536_v33 = vmul.f32 0.0625, %v520_v36 }
  0x65   : > { %v604_v44 = vsel %vm603_vm5, %v534_v43, %v602_v23 }
  0x66   : > { %v606_v45 = vsel %vm605_vm6, %v536_v33, %v604_v44 }
  0x67   : > { %681 = vmatmul.mubr.f32.vlgmr.msra.gmra.mrb[0].mxu0 %v606_v45  ;;  %792 = vmatmul.mubr.f32.vlgmr.msra.gmra.mrb[0].mxu1 %v606_v45 }
 0x13a   : > { %v972_v46 = vpop.f32.mrb[0].mxu0  ;;  %v1007_v47 = vpop.f32.mrb[0].mxu1 }
 0x13b   : > { %v973_v49 = vpop.f32.mrb[1].mxu0  ;;  %v1008_v51 = vpop.f32.mrb[1].mxu1 }
 0x13c   : > { %v974_v52 = vadd.f32 %v973_v49, %v972_v46  ;;  %v1009_v53 = vadd.f32 %v1008_v51, %v1007_v47 }
 0x13e   : > { %v683_v54 = vadd.f32 %v974_v52, %v931_v48  ;;  %v794_v55 = vadd.f32 %v1009_v53, %v932_v50 }
 0x140   : > { %687 = vst.msk [vmem:[%s251_s28] sm:$0xff] %vm686_vm7, %v683_v54 }
 0x141   : > { %798 = vst.msk [vmem:[%s258_s29] sm:$0xff] %vm797_vm8, %v794_v55 }
 0x142   : > { %1131 = shalt.err (!%p1128_p3)
}
 0x143   : > { %s1132_s14 = scalar_lea.hbm %s1615_s13, 128  ;;  %s1136_s12 = scalar_lea.hbm %s1692_s5, 256 }
 0x144   : > { %p1133_p4 = scmp.ne.s32.totalorder %s1615_s13, %s1132_s14  ;;  %p1137_p9 = scmp.lt.u32.totalorder %s1615_s13, %s1692_s5 }
 0x145   : > { %p1138_p10 = scmp.lt.u32.totalorder %s1136_s12, %s1132_s14  ;;  %p1140_p12 = scmp.lt.u32.totalorder %s1132_s14, %s1615_s13 }
 0x146   : > { %p1134_p7 = pnand %p1133_p4, %p1289_p5 }
 0x147   : > { %p1139_p11 = por %p1138_p10, %p1137_p9 }
 0x148   : > { %p1135_p8 = pneg %p1134_p7 }
 0x149   : > { %p1141_p13 = por %p1140_p12, %p1139_p11 }
 0x14b   : > { %p1142_p0 = pnand %p1141_p13, %p1135_p8 }
 0x14d   : > { %1145 = shalt.err (!%p1142_p0)
}
 0x14e   : > { %1074 = dma.vmem_to_hbm [thread:$0]  (%p1289_p5), %s1617_s26, 128, %s1615_s13, %s800_s9  }
 0x14f   : > { %s805_s18 = scalar_lea.sflag [#allocation5], %s1602_s16  ;;  %s1146_s19 = scalar_lea.vmem %s1624_s10, 128 }
 0x150   : > { %p1147_p1 = scmp.ne.s32.totalorder %s1624_s10, %s1146_s19  ;;  %s1215_s20 = smov [#allocation4]  }
 0x151   : > { %s1150_s11 = sshll.u32 %s1215_s20, 4  ;;  %s1151_s11 = int_to_ptr.vmem [resolvable:$false] %s1150_s11 }
 0x152   : > { %p1148_p2 = pnand %p1147_p1, %p1289_p5  ;;  %s1152_s14 = scalar_lea.vmem %s1151_s11, 256 }
 0x153   : > { %p1153_p4 = scmp.lt.s32.totalorder %s1624_s10, %s1151_s11  ;;  %p1154_p7 = scmp.lt.s32.totalorder %s1152_s14, %s1146_s19 }
 0x154   : > { %p1149_p3 = pneg %p1148_p2 }
 0x155   : > { %p1155_p8 = por %p1154_p7, %p1153_p4 }
 0x157   : > { %p1156_p9 = pnand %p1155_p8, %p1149_p3 }
 0x159   : > { %1159 = shalt.err (!%p1156_p9)
}
 0x15a   : > { %s1160_s16 = scalar_lea.hbm %s1622_s17, 128  ;;  %s1164_s9 = scalar_lea.hbm %s1693_s6, 256 }
 0x15b   : > { %p1161_p10 = scmp.ne.s32.totalorder %s1622_s17, %s1160_s16  ;;  %p1165_p13 = scmp.lt.u32.totalorder %s1622_s17, %s1693_s6 }
 0x15c   : > { %p1166_p0 = scmp.lt.u32.totalorder %s1164_s9, %s1160_s16  ;;  %p1168_p2 = scmp.lt.u32.totalorder %s1160_s16, %s1622_s17 }
 0x15d   : > { %p1162_p11 = pnand %p1161_p10, %p1289_p5 }
 0x15e   : > { %p1167_p1 = por %p1166_p0, %p1165_p13 }
 0x15f   : > { %p1163_p12 = pneg %p1162_p11 }
 0x160   : > { %p1169_p3 = por %p1168_p2, %p1167_p1 }
 0x162   : > { %p1170_p4 = pnand %p1169_p3, %p1163_p12 }
 0x164   : > { %1173 = shalt.err (!%p1170_p4)
}
 0x165   : > { %1075 = dma.vmem_to_hbm [thread:$0]  (%p1289_p5), %s1624_s10, 128, %s1622_s17, %s805_s18  }
 0x166 PF: > { %p1085_p7 = scmp.ge.s32.totalorder %s1212_s24, 2  ;;  %s843_s12 = sand.u32 1, %s1200_s21  }
 0x167   : > { %s844_s25 = scalar_lea.sflag [#allocation3], %s843_s12 }
 0x168   : > { %p1079_p8 = pnand %p1085_p7, %p1293_p6 }
 0x16a   : > { %1191 = dma.done.wait (!%p1079_p8), %s844_s25, 128  }
 0x16b   : > { %1193 = vsyncadd (!%p1079_p8), %s844_s25, 4294967168  ;;  %s853_s15 = scalar_lea.sflag [#allocation5], %s843_s12 }
 0x16c   : > { %1195 = dma.done.wait (!%p1079_p8), %s853_s15, 128  }
 0x16d   : > { %1197 = vsyncadd (!%p1079_p8), %s853_s15, 4294967168  ;;  %p20_p5 = scmp.ge.s32.totalorder %s1276_s27, 4   ;;  %s1697_s21 = smov %s1204_s22 }
 0x16e   : > { %s1698_s22 = smov %s1208_s23  ;;  %s1699_s23 = smov %s1287_s30 }
 0x16f   : > { %s1700_s24 = smov %s1276_s27  ;;  %22 = sbr.rel (!%p20_p5) target bundleno = 5 (0x5), region = 92 }
 0x176   :  { %858 = vsyncpa [#allocation3], 1 }
 0x177   :  { %860 = vsyncpa [#allocation3 + $0x1], 1 }
 0x178   :  { %861 = vsyncpa [#allocation5], 1 }
 0x179   :  { %863 = vsyncpa [#allocation5 + $0x1], 1 }

</bundles_post_ra>
